<compile_context>
chip_gen: v6e
topology: v6e:2x2x1
jax: 0.10.0
libtpu: 0.0.40
codegen_flags: <defaults>
</compile_context>

<pallas_src>
import functools
import math

import numpy as np
import jax
import jax.numpy as jnp
from jax.experimental import pallas as pl
from jax.experimental.pallas import tpu as pltpu


def _round_up(x, m):
    return ((x + m - 1) // m) * m


def _choose_batch_tile(B, block_b):
    """Batch tile: multiple of 8, capped at block_b.  Whenever the batch is
    large enough to tile, keep the number of tiles even so v7x's two
    TensorCores split the grid evenly (no effect on v5e/v6e correctness)."""
    b8 = _round_up(max(B, 1), 8)
    tb = min(block_b, b8)
    n = -(-b8 // tb)
    if n == 1 and b8 >= 256:
        tb = _round_up(-(-b8 // 2), 8)          # split one big tile across 2 TCs
    elif n > 1 and n % 2 == 1:
        tb = _round_up(-(-b8 // (n + 1)), 8)    # rebalance odd tile counts
    return tb


# ----------------------------- Pallas kernel ------------------------------ #
def wine_side_fusion_kernel(base_ref, side_ref,
                            w_sp_ref, b_sp_ref,
                            w_kv_ref, b_kv_ref,
                            w_qf_ref, b_qf_ref,
                            w_o_ref, b_o_ref,
                            w_fc_attn_ref, b_fc_ref,
                            o_ref, *, num_tokens, scale):
    f32 = jnp.float32
    base = base_ref[...]                         # (TB, D)       compute dtype
    side = side_ref[...]                         # (T, TB, S_pad) compute dtype
    cdt = base.dtype
    tb, D = base.shape
    T = num_tokens

    # side_proj for all T tokens at once.  (T, TB, S)->(T*TB, S) only collapses
    # leading dims (TB % 8 == 0, S_pad % 128 == 0) so it is a no-op on layout.
    side2d = side.reshape(T * tb, side.shape[-1])
    h = (jnp.dot(side2d, w_sp_ref[...], preferred_element_type=f32)
         + b_sp_ref[...]).astype(cdt)            # (T*TB, D)

    # Fused K/V projection: one MXU issue with N = 2D.
    kv = (jnp.dot(h, w_kv_ref[...], preferred_element_type=f32)
          + b_kv_ref[...]).astype(cdt)           # (T*TB, 2D)

    # Fused q / fc-base projection off `base`: one MXU issue with N = D + F.
    qf = jnp.dot(base, w_qf_ref[...], preferred_element_type=f32) + b_qf_ref[...]
    q = qf[:, :D] * scale                        # (TB, D) f32 (bias included)
    fc_base = qf[:, D:]                          # (TB, F) f32, used in epilogue

    # Length-T attention without a dense score matrix:
    #   s_t = lane-reduce(q * k_t)  (VPU mul + XLU reduce, T unrolled),
    #   softmax over the T columns, attn = sum_t p_t * v_t (broadcast FMAs).
    s = []
    for t in range(T):
        k_t = kv[t * tb:(t + 1) * tb, :D]        # static sublane/lane slice
        s.append(jnp.sum(q * k_t, axis=-1, keepdims=True))   # (TB, 1) f32
    m = s[0]
    for t in range(1, T):
        m = jnp.maximum(m, s[t])
    e = [jnp.exp(s_t - m) for s_t in s]
    denom = e[0]
    for t in range(1, T):
        denom = denom + e[t]
    inv = pl.reciprocal(denom, approx=True)      # EUP slot, ~free
    attn = None
    for t in range(T):
        v_t = kv[t * tb:(t + 1) * tb, D:]
        contrib = (e[t] * inv) * v_t             # (TB,1) f32 bcast * (TB, D)
        attn = contrib if attn is None else attn + contrib
    attn = attn.astype(cdt)

    # out_proj then fc:  fc(cat([base, attn])) = fc_base + attn_o @ Wfc_attn + b_fc
    attn_o = (jnp.dot(attn, w_o_ref[...], preferred_element_type=f32)
              + b_o_ref[...]).astype(cdt)
    fused = (fc_base
             + jnp.dot(attn_o, w_fc_attn_ref[...], preferred_element_type=f32)
             + b_fc_ref[...])
    o_ref[...] = fused.astype(o_ref.dtype)


# ------------------------------ Wrapper ----------------------------------- #
def wine_side_fusion_forward(prep, base, side_seq, *, block_b=512,
                             out_dtype=jnp.float32):
    """prep: output of prepare_params(). base: (B, D). side_seq: (B, T, S)."""
    B, D = base.shape
    _, T, S = side_seq.shape
    S_pad = prep["w_sp"].shape[0]
    F = prep["b_fc"].shape[-1]
    cdt = prep["w_qf"].dtype

    tb = _choose_batch_tile(B, block_b)
    b_pad = _round_up(B, tb)
    n_tiles = b_pad // tb

    base_p = base.astype(cdt)
    # Token-major side layout so each token's K/V rows are a static sublane
    # slice in-kernel; zero-pad the feature dim to the lane-dense S_pad.
    side_p = jnp.transpose(side_seq, (1, 0, 2)).astype(cdt)     # (T, B, S)
    pad_s, pad_b = S_pad - S, b_pad - B
    if pad_s or pad_b:
        side_p = jnp.pad(side_p, ((0, 0), (0, pad_b), (0, pad_s)))
    if pad_b:
        base_p = jnp.pad(base_p, ((0, pad_b), (0, 0)))

    tile = lambda i: (i, 0)          # streamed per batch tile
    side_tile = lambda i: (0, i, 0)
    resident = lambda i: (0, 0)      # weights: same block every step -> stay in VMEM

    weight_names = ("w_sp", "b_sp", "w_kv", "b_kv", "w_qf", "b_qf",
                    "w_o", "b_o", "w_fc_attn", "b_fc")
    w_specs = [pl.BlockSpec(prep[n].shape, resident) for n in weight_names]

    itemsize = jnp.dtype(cdt).itemsize
    weight_bytes = sum(int(np.prod(prep[n].shape)) * jnp.dtype(prep[n].dtype).itemsize
                       for n in weight_names)
    flops = 2 * b_pad * (T * S_pad * D          # side_proj
                         + T * D * 2 * D        # fused K/V
                         + D * (D + F)          # fused q / fc_base
                         + 2 * T * D            # scores + weighted sum
                         + D * D + D * F)       # out_proj + fc_attn
    cost = pl.CostEstimate(
        flops=int(flops),
        transcendentals=int(b_pad * (T + 1)),
        bytes_accessed=int(b_pad * D * itemsize + b_pad * T * S_pad * itemsize
                           + b_pad * F * jnp.dtype(out_dtype).itemsize
                           + weight_bytes))

    kernel = functools.partial(wine_side_fusion_kernel,
                               num_tokens=T, scale=1.0 / math.sqrt(D))

    out = pl.pallas_call(
        kernel,
        out_shape=jax.ShapeDtypeStruct((b_pad, F), out_dtype),
        grid=(n_tiles,),
        in_specs=[pl.BlockSpec((tb, D), tile),
                  pl.BlockSpec((T, tb, S_pad), side_tile)] + w_specs,
        out_specs=pl.BlockSpec((tb, F), tile),
        compiler_params=pltpu.CompilerParams(
            dimension_semantics=("parallel",),
            vmem_limit_bytes=64 * 1024 * 1024),
        cost_estimate=cost,
    )(base_p, side_p, *(prep[n] for n in weight_names))

    return out[:B]


# ----------------------- Parameters (PyTorch layout) ----------------------- #
def init_params(key, base_dim, side_dim, fusion_dim):
    ks = jax.random.split(key, 8)

    def w(k, shape, fan_in):
        return jax.random.normal(k, shape, jnp.float32) / math.sqrt(fan_in)

    return {
        "side_proj_w": w(ks[0], (base_dim, side_dim), side_dim),       # (out, in)
        "side_proj_b": w(ks[1], (base_dim,), base_dim),
        "in_proj_w":   w(ks[2], (3 * base_dim, base_dim), base_dim),   # q/k/v stacked
        "in_proj_b":   w(ks[3], (3 * base_dim,), base_dim),
        "out_proj_w":  w(ks[4], (base_dim, base_dim), base_dim),
        "out_proj_b":  w(ks[5], (base_dim,), base_dim),
        "fc_w":        w(ks[6], (fusion_dim, 2 * base_dim), 2 * base_dim),
        "fc_b":        w(ks[7], (fusion_dim,), fusion_dim),
    }


def prepare_params(params, compute_dtype=jnp.bfloat16):
    """One-time re-layout: transpose to (in, out), fuse K/V and q/fc_base,
    split fc into base/attn halves, zero-pad side features to 128, cast."""
    f32 = jnp.float32
    E = params["out_proj_w"].shape[0]            # base_dim D
    F = params["fc_w"].shape[0]
    S = params["side_proj_w"].shape[1]
    S_pad = _round_up(S, 128)

    wq, wk, wv = (params["in_proj_w"][:E], params["in_proj_w"][E:2 * E],
                  params["in_proj_w"][2 * E:])
    bq, bk, bv = (params["in_proj_b"][:E], params["in_proj_b"][E:2 * E],
                  params["in_proj_b"][2 * E:])

    w_sp = jnp.pad(params["side_proj_w"].T, ((0, S_pad - S), (0, 0)))   # (S_pad, E)
    w_kv = jnp.concatenate([wk.T, wv.T], axis=1)                        # (E, 2E)
    b_kv = jnp.concatenate([bk, bv])
    w_qf = jnp.concatenate([wq.T, params["fc_w"][:, :E].T], axis=1)     # (E, E+F)
    b_qf = jnp.concatenate([bq, jnp.zeros((F,), f32)])

    row = lambda b: jnp.asarray(b, f32).reshape(1, -1)   # biases stay f32
    cd = lambda w: jnp.asarray(w, dtype=compute_dtype)
    return {
        "w_sp": cd(w_sp), "b_sp": row(params["side_proj_b"]),
        "w_kv": cd(w_kv), "b_kv": row(b_kv),
        "w_qf": cd(w_qf), "b_qf": row(b_qf),
        "w_o": cd(params["out_proj_w"].T), "b_o": row(params["out_proj_b"]),
        "w_fc_attn": cd(params["fc_w"][:, E:].T), "b_fc": row(params["fc_b"]),
    }


# Pure-JAX f32 reference (mirrors the PyTorch forward exactly).
def reference_forward(params, base, side_seq):
    E = params["out_proj_w"].shape[0]
    sp = jnp.einsum("bts,es->bte", side_seq, params["side_proj_w"]) + params["side_proj_b"]
    wq, wk, wv = (params["in_proj_w"][:E], params["in_proj_w"][E:2 * E],
                  params["in_proj_w"][2 * E:])
    bq, bk, bv = (params["in_proj_b"][:E], params["in_proj_b"][E:2 * E],
                  params["in_proj_b"][2 * E:])
    q = (base @ wq.T + bq) / math.sqrt(E)                     # (B, E)
    k = jnp.einsum("bte,de->btd", sp, wk) + bk                # (B, T, E)
    v = jnp.einsum("bte,de->btd", sp, wv) + bv
    scores = jnp.einsum("be,bte->bt", q, k)
    attn_w = jax.nn.softmax(scores, axis=-1)
    attn = jnp.einsum("bt,bte->be", attn_w, v)
    attn = attn @ params["out_proj_w"].T + params["out_proj_b"]
    fused = jnp.concatenate([base, attn], axis=1) @ params["fc_w"].T + params["fc_b"]
    return fused


if __name__ == "__main__":
    base_dim, side_dim, fusion_dim, num_side_tokens = 256, 64, 256, 4

    key = jax.random.PRNGKey(0)
    kp, kb1, ks1, kb2, ks2 = jax.random.split(key, 5)
    params = init_params(kp, base_dim, side_dim, fusion_dim)

    # Check 1: tiny batch (B=2), single grid step, f32 compute path.
    B1 = 2
    base1 = jax.random.normal(kb1, (B1, base_dim), jnp.float32)
    side1 = jax.random.normal(ks1, (B1, num_side_tokens, side_dim), jnp.float32)
    prep32 = prepare_params(params, jnp.float32)
    out1 = jax.block_until_ready(wine_side_fusion_forward(prep32, base1, side1))
    ref1 = reference_forward(params, base1, side1)
    assert out1.shape == (B1, fusion_dim)
    np.testing.assert_allclose(np.asarray(out1), np.asarray(ref1), rtol=5e-2, atol=5e-2)

    # Check 2: B=300 -> two balanced 152-row tiles (exercises the batch grid,
    # even tile count for megacore, padding) with bf16 streamed data/weights.
    B2 = 300
    base2 = jax.random.normal(kb2, (B2, base_dim), jnp.float32)
    side2 = jax.random.normal(ks2, (B2, num_side_tokens, side_dim), jnp.float32)
    prep16 = prepare_params(params, jnp.bfloat16)
    out2 = jax.block_until_ready(
        wine_side_fusion_forward(prep16, base2, side2, block_b=512))
    ref2 = reference_forward(params, base2, side2)
    assert out2.shape == (B2, fusion_dim)
    np.testing.assert_allclose(np.asarray(out2), np.asarray(ref2), rtol=1e-1, atol=1e-1)

    print("KERNEL_OK")
</pallas_src>

<mosaic_0001>
module attributes {stable_mosaic.version = 11 : i64} {
  func.func @wine_side_fusion_kernel(%arg0: i32, %arg1: memref<8x256xf32, #tpu.memory_space<vmem>>, %arg2: memref<4x8x128xf32, #tpu.memory_space<vmem>>, %arg3: memref<128x256xf32, #tpu.memory_space<vmem>>, %arg4: memref<1x256xf32, #tpu.memory_space<vmem>>, %arg5: memref<256x512xf32, #tpu.memory_space<vmem>>, %arg6: memref<1x512xf32, #tpu.memory_space<vmem>>, %arg7: memref<256x512xf32, #tpu.memory_space<vmem>>, %arg8: memref<1x512xf32, #tpu.memory_space<vmem>>, %arg9: memref<256x256xf32, #tpu.memory_space<vmem>>, %arg10: memref<1x256xf32, #tpu.memory_space<vmem>>, %arg11: memref<256x256xf32, #tpu.memory_space<vmem>>, %arg12: memref<1x256xf32, #tpu.memory_space<vmem>>, %arg13: memref<8x256xf32, #tpu.memory_space<vmem>>) attributes {dimension_semantics = [#tpu.dimension_semantics<parallel>], iteration_bounds = array<i64: 1>, scalar_prefetch = 0 : i64, scratch_operands = 0 : i64, tpu.core_type = #tpu.core_type<tc>, window_params = [{transform_indices = @transform_0, window_bounds = array<i64: 8, 256>}, {transform_indices = @transform_1, window_bounds = array<i64: 4, 8, 128>}, {pipeline_mode = #tpu.pipeline_mode<synchronous>, transform_indices = @transform_2, window_bounds = array<i64: 128, 256>}, {pipeline_mode = #tpu.pipeline_mode<synchronous>, transform_indices = @transform_3, window_bounds = array<i64: 1, 256>}, {pipeline_mode = #tpu.pipeline_mode<synchronous>, transform_indices = @transform_4, window_bounds = array<i64: 256, 512>}, {pipeline_mode = #tpu.pipeline_mode<synchronous>, transform_indices = @transform_5, window_bounds = array<i64: 1, 512>}, {pipeline_mode = #tpu.pipeline_mode<synchronous>, transform_indices = @transform_6, window_bounds = array<i64: 256, 512>}, {pipeline_mode = #tpu.pipeline_mode<synchronous>, transform_indices = @transform_7, window_bounds = array<i64: 1, 512>}, {pipeline_mode = #tpu.pipeline_mode<synchronous>, transform_indices = @transform_8, window_bounds = array<i64: 256, 256>}, {pipeline_mode = #tpu.pipeline_mode<synchronous>, transform_indices = @transform_9, window_bounds = array<i64: 1, 256>}, {pipeline_mode = #tpu.pipeline_mode<synchronous>, transform_indices = @transform_10, window_bounds = array<i64: 256, 256>}, {pipeline_mode = #tpu.pipeline_mode<synchronous>, transform_indices = @transform_11, window_bounds = array<i64: 1, 256>}, {transform_indices = @transform_12, window_bounds = array<i64: 8, 256>}]} {
    %c0 = arith.constant 0 : index
    %c0_0 = arith.constant 0 : index
    %0 = vector.load %arg1[%c0, %c0_0] : memref<8x256xf32, #tpu.memory_space<vmem>>, vector<8x256xf32>
    %c0_1 = arith.constant 0 : index
    %c0_2 = arith.constant 0 : index
    %c0_3 = arith.constant 0 : index
    %1 = vector.load %arg2[%c0_1, %c0_2, %c0_3] : memref<4x8x128xf32, #tpu.memory_space<vmem>>, vector<4x8x128xf32>
    %2 = vector.shape_cast %1 : vector<4x8x128xf32> to vector<32x128xf32>
    %c0_4 = arith.constant 0 : index
    %c0_5 = arith.constant 0 : index
    %3 = vector.load %arg3[%c0_4, %c0_5] : memref<128x256xf32, #tpu.memory_space<vmem>>, vector<128x256xf32>
    %cst = arith.constant dense<0.000000e+00> : vector<32x256xf32>
    %4 = tpu.matmul %2, %3, %cst {dimension_numbers = #tpu.dot_dimension_numbers<[1], [0], [0], [1], [0, 0, 1, 1], [], []>} : vector<32x128xf32>, vector<128x256xf32>, vector<32x256xf32> -> vector<32x256xf32>
    %c0_6 = arith.constant 0 : index
    %c0_7 = arith.constant 0 : index
    %5 = vector.load %arg4[%c0_6, %c0_7] : memref<1x256xf32, #tpu.memory_space<vmem>>, vector<1x256xf32>
    %6 = vector.broadcast %5 : vector<1x256xf32> to vector<32x256xf32>
    %7 = arith.addf %4, %6 : vector<32x256xf32>
    %c0_8 = arith.constant 0 : index
    %c0_9 = arith.constant 0 : index
    %8 = vector.load %arg5[%c0_8, %c0_9] : memref<256x512xf32, #tpu.memory_space<vmem>>, vector<256x512xf32>
    %cst_10 = arith.constant dense<0.000000e+00> : vector<32x512xf32>
    %9 = tpu.matmul %7, %8, %cst_10 {dimension_numbers = #tpu.dot_dimension_numbers<[1], [0], [0], [1], [0, 0, 1, 1], [], []>} : vector<32x256xf32>, vector<256x512xf32>, vector<32x512xf32> -> vector<32x512xf32>
    %c0_11 = arith.constant 0 : index
    %c0_12 = arith.constant 0 : index
    %10 = vector.load %arg6[%c0_11, %c0_12] : memref<1x512xf32, #tpu.memory_space<vmem>>, vector<1x512xf32>
    %11 = vector.broadcast %10 : vector<1x512xf32> to vector<32x512xf32>
    %12 = arith.addf %9, %11 : vector<32x512xf32>
    %c0_13 = arith.constant 0 : index
    %c0_14 = arith.constant 0 : index
    %13 = vector.load %arg7[%c0_13, %c0_14] : memref<256x512xf32, #tpu.memory_space<vmem>>, vector<256x512xf32>
    %cst_15 = arith.constant dense<0.000000e+00> : vector<8x512xf32>
    %14 = tpu.matmul %0, %13, %cst_15 {dimension_numbers = #tpu.dot_dimension_numbers<[1], [0], [0], [1], [0, 0, 1, 1], [], []>} : vector<8x256xf32>, vector<256x512xf32>, vector<8x512xf32> -> vector<8x512xf32>
    %c0_16 = arith.constant 0 : index
    %c0_17 = arith.constant 0 : index
    %15 = vector.load %arg8[%c0_16, %c0_17] : memref<1x512xf32, #tpu.memory_space<vmem>>, vector<1x512xf32>
    %16 = vector.broadcast %15 : vector<1x512xf32> to vector<8x512xf32>
    %17 = arith.addf %14, %16 : vector<8x512xf32>
    %18 = vector.extract_strided_slice %17 {offsets = [0, 0], sizes = [8, 256], strides = [1, 1]} : vector<8x512xf32> to vector<8x256xf32>
    %cst_18 = arith.constant 6.250000e-02 : f32
    %19 = vector.broadcast %cst_18 : f32 to vector<8x256xf32>
    %20 = arith.mulf %18, %19 : vector<8x256xf32>
    %21 = vector.extract_strided_slice %17 {offsets = [0, 256], sizes = [8, 256], strides = [1, 1]} : vector<8x512xf32> to vector<8x256xf32>
    %22 = vector.extract_strided_slice %12 {offsets = [0, 0], sizes = [8, 256], strides = [1, 1]} : vector<32x512xf32> to vector<8x256xf32>
    %23 = arith.mulf %20, %22 : vector<8x256xf32>
    %cst_19 = arith.constant dense<0.000000e+00> : vector<8xf32>
    %24 = vector.multi_reduction <add>, %23, %cst_19 [1] : vector<8x256xf32> to vector<8xf32>
    %25 = vector.shape_cast %24 : vector<8xf32> to vector<8x1xf32>
    %26 = vector.extract_strided_slice %12 {offsets = [8, 0], sizes = [8, 256], strides = [1, 1]} : vector<32x512xf32> to vector<8x256xf32>
    %27 = arith.mulf %20, %26 : vector<8x256xf32>
    %cst_20 = arith.constant dense<0.000000e+00> : vector<8xf32>
    %28 = vector.multi_reduction <add>, %27, %cst_20 [1] : vector<8x256xf32> to vector<8xf32>
    %29 = vector.shape_cast %28 : vector<8xf32> to vector<8x1xf32>
    %30 = vector.extract_strided_slice %12 {offsets = [16, 0], sizes = [8, 256], strides = [1, 1]} : vector<32x512xf32> to vector<8x256xf32>
    %31 = arith.mulf %20, %30 : vector<8x256xf32>
    %cst_21 = arith.constant dense<0.000000e+00> : vector<8xf32>
    %32 = vector.multi_reduction <add>, %31, %cst_21 [1] : vector<8x256xf32> to vector<8xf32>
    %33 = vector.shape_cast %32 : vector<8xf32> to vector<8x1xf32>
    %34 = vector.extract_strided_slice %12 {offsets = [24, 0], sizes = [8, 256], strides = [1, 1]} : vector<32x512xf32> to vector<8x256xf32>
    %35 = arith.mulf %20, %34 : vector<8x256xf32>
    %cst_22 = arith.constant dense<0.000000e+00> : vector<8xf32>
    %36 = vector.multi_reduction <add>, %35, %cst_22 [1] : vector<8x256xf32> to vector<8xf32>
    %37 = vector.shape_cast %36 : vector<8xf32> to vector<8x1xf32>
    %38 = arith.maximumf %25, %29 : vector<8x1xf32>
    %39 = arith.maximumf %38, %33 : vector<8x1xf32>
    %40 = arith.maximumf %39, %37 : vector<8x1xf32>
    %41 = arith.subf %25, %40 : vector<8x1xf32>
    %42 = math.exp %41 : vector<8x1xf32>
    %43 = arith.subf %29, %40 : vector<8x1xf32>
    %44 = math.exp %43 : vector<8x1xf32>
    %45 = arith.subf %33, %40 : vector<8x1xf32>
    %46 = math.exp %45 : vector<8x1xf32>
    %47 = arith.subf %37, %40 : vector<8x1xf32>
    %48 = math.exp %47 : vector<8x1xf32>
    %49 = arith.addf %42, %44 : vector<8x1xf32>
    %50 = arith.addf %49, %46 : vector<8x1xf32>
    %51 = arith.addf %50, %48 : vector<8x1xf32>
    %52 = tpu.reciprocal %51 {approx = true} : vector<8x1xf32> -> vector<8x1xf32>
    %53 = vector.extract_strided_slice %12 {offsets = [0, 256], sizes = [8, 256], strides = [1, 1]} : vector<32x512xf32> to vector<8x256xf32>
    %54 = arith.mulf %42, %52 : vector<8x1xf32>
    %55 = vector.broadcast %54 : vector<8x1xf32> to vector<8x256xf32>
    %56 = arith.mulf %55, %53 : vector<8x256xf32>
    %57 = vector.extract_strided_slice %12 {offsets = [8, 256], sizes = [8, 256], strides = [1, 1]} : vector<32x512xf32> to vector<8x256xf32>
    %58 = arith.mulf %44, %52 : vector<8x1xf32>
    %59 = vector.broadcast %58 : vector<8x1xf32> to vector<8x256xf32>
    %60 = arith.mulf %59, %57 : vector<8x256xf32>
    %61 = arith.addf %56, %60 : vector<8x256xf32>
    %62 = vector.extract_strided_slice %12 {offsets = [16, 256], sizes = [8, 256], strides = [1, 1]} : vector<32x512xf32> to vector<8x256xf32>
    %63 = arith.mulf %46, %52 : vector<8x1xf32>
    %64 = vector.broadcast %63 : vector<8x1xf32> to vector<8x256xf32>
    %65 = arith.mulf %64, %62 : vector<8x256xf32>
    %66 = arith.addf %61, %65 : vector<8x256xf32>
    %67 = vector.extract_strided_slice %12 {offsets = [24, 256], sizes = [8, 256], strides = [1, 1]} : vector<32x512xf32> to vector<8x256xf32>
    %68 = arith.mulf %48, %52 : vector<8x1xf32>
    %69 = vector.broadcast %68 : vector<8x1xf32> to vector<8x256xf32>
    %70 = arith.mulf %69, %67 : vector<8x256xf32>
    %71 = arith.addf %66, %70 : vector<8x256xf32>
    %c0_23 = arith.constant 0 : index
    %c0_24 = arith.constant 0 : index
    %72 = vector.load %arg9[%c0_23, %c0_24] : memref<256x256xf32, #tpu.memory_space<vmem>>, vector<256x256xf32>
    %cst_25 = arith.constant dense<0.000000e+00> : vector<8x256xf32>
    %73 = tpu.matmul %71, %72, %cst_25 {dimension_numbers = #tpu.dot_dimension_numbers<[1], [0], [0], [1], [0, 0, 1, 1], [], []>} : vector<8x256xf32>, vector<256x256xf32>, vector<8x256xf32> -> vector<8x256xf32>
    %c0_26 = arith.constant 0 : index
    %c0_27 = arith.constant 0 : index
    %74 = vector.load %arg10[%c0_26, %c0_27] : memref<1x256xf32, #tpu.memory_space<vmem>>, vector<1x256xf32>
    %75 = vector.broadcast %74 : vector<1x256xf32> to vector<8x256xf32>
    %76 = arith.addf %73, %75 : vector<8x256xf32>
    %c0_28 = arith.constant 0 : index
    %c0_29 = arith.constant 0 : index
    %77 = vector.load %arg11[%c0_28, %c0_29] : memref<256x256xf32, #tpu.memory_space<vmem>>, vector<256x256xf32>
    %cst_30 = arith.constant dense<0.000000e+00> : vector<8x256xf32>
    %78 = tpu.matmul %76, %77, %cst_30 {dimension_numbers = #tpu.dot_dimension_numbers<[1], [0], [0], [1], [0, 0, 1, 1], [], []>} : vector<8x256xf32>, vector<256x256xf32>, vector<8x256xf32> -> vector<8x256xf32>
    %79 = arith.addf %21, %78 : vector<8x256xf32>
    %c0_31 = arith.constant 0 : index
    %c0_32 = arith.constant 0 : index
    %80 = vector.load %arg12[%c0_31, %c0_32] : memref<1x256xf32, #tpu.memory_space<vmem>>, vector<1x256xf32>
    %81 = vector.broadcast %80 : vector<1x256xf32> to vector<8x256xf32>
    %82 = arith.addf %79, %81 : vector<8x256xf32>
    %c0_33 = arith.constant 0 : index
    %c0_34 = arith.constant 0 : index
    %83 = vector.load %arg13[%c0_33, %c0_34] : memref<8x256xf32, #tpu.memory_space<vmem>>, vector<8x256xf32>
    tpu.vector_store %arg13[%c0_33, %c0_34], %82 {strides = array<i32>} : memref<8x256xf32, #tpu.memory_space<vmem>>, vector<8x256xf32>,
    return
  }
  func.func @transform_0(%arg0: i32) -> (i32, i32) {
    %c0_i32 = arith.constant 0 : i32
    %c0_i32_0 = arith.constant 0 : i32
    return %arg0, %c0_i32 : i32, i32
  }
  func.func @transform_1(%arg0: i32) -> (i32, i32, i32) {
    %c0_i32 = arith.constant 0 : i32
    %c0_i32_0 = arith.constant 0 : i32
    %c0_i32_1 = arith.constant 0 : i32
    return %c0_i32, %arg0, %c0_i32_0 : i32, i32, i32
  }
  func.func @transform_2(%arg0: i32) -> (i32, i32) {
    %c0_i32 = arith.constant 0 : i32
    %c0_i32_0 = arith.constant 0 : i32
    %c0_i32_1 = arith.constant 0 : i32
    return %c0_i32, %c0_i32_0 : i32, i32
  }
  func.func @transform_3(%arg0: i32) -> (i32, i32) {
    %c0_i32 = arith.constant 0 : i32
    %c0_i32_0 = arith.constant 0 : i32
    %c0_i32_1 = arith.constant 0 : i32
    return %c0_i32, %c0_i32_0 : i32, i32
  }
  func.func @transform_4(%arg0: i32) -> (i32, i32) {
    %c0_i32 = arith.constant 0 : i32
    %c0_i32_0 = arith.constant 0 : i32
    %c0_i32_1 = arith.constant 0 : i32
    return %c0_i32, %c0_i32_0 : i32, i32
  }
  func.func @transform_5(%arg0: i32) -> (i32, i32) {
    %c0_i32 = arith.constant 0 : i32
    %c0_i32_0 = arith.constant 0 : i32
    %c0_i32_1 = arith.constant 0 : i32
    return %c0_i32, %c0_i32_0 : i32, i32
  }
  func.func @transform_6(%arg0: i32) -> (i32, i32) {
    %c0_i32 = arith.constant 0 : i32
    %c0_i32_0 = arith.constant 0 : i32
    %c0_i32_1 = arith.constant 0 : i32
    return %c0_i32, %c0_i32_0 : i32, i32
  }
  func.func @transform_7(%arg0: i32) -> (i32, i32) {
    %c0_i32 = arith.constant 0 : i32
    %c0_i32_0 = arith.constant 0 : i32
    %c0_i32_1 = arith.constant 0 : i32
    return %c0_i32, %c0_i32_0 : i32, i32
  }
  func.func @transform_8(%arg0: i32) -> (i32, i32) {
    %c0_i32 = arith.constant 0 : i32
    %c0_i32_0 = arith.constant 0 : i32
    %c0_i32_1 = arith.constant 0 : i32
    return %c0_i32, %c0_i32_0 : i32, i32
  }
  func.func @transform_9(%arg0: i32) -> (i32, i32) {
    %c0_i32 = arith.constant 0 : i32
    %c0_i32_0 = arith.constant 0 : i32
    %c0_i32_1 = arith.constant 0 : i32
    return %c0_i32, %c0_i32_0 : i32, i32
  }
  func.func @transform_10(%arg0: i32) -> (i32, i32) {
    %c0_i32 = arith.constant 0 : i32
    %c0_i32_0 = arith.constant 0 : i32
    %c0_i32_1 = arith.constant 0 : i32
    return %c0_i32, %c0_i32_0 : i32, i32
  }
  func.func @transform_11(%arg0: i32) -> (i32, i32) {
    %c0_i32 = arith.constant 0 : i32
    %c0_i32_0 = arith.constant 0 : i32
    %c0_i32_1 = arith.constant 0 : i32
    return %c0_i32, %c0_i32_0 : i32, i32
  }
  func.func @transform_12(%arg0: i32) -> (i32, i32) {
    %c0_i32 = arith.constant 0 : i32
    %c0_i32_0 = arith.constant 0 : i32
    return %arg0, %c0_i32 : i32, i32
  }
}

</mosaic_0001>

<bundles_post_ra>
// kernel: tpu_custom_call.1
= control target key start
LH: loop header
LB: loop body
LE: loop exit
PB: predicated region body
PF: predicated region fallthrough
CT: control target
= control target key end

     0   :  { %17 = vsyncpa [#allocation3], 0  ;;  %s1696_s0 = inlined_call_operand.hbm [shape: f32[8,256], index: 0, kind: input, shape index: {}]   ;;  %s1697_s1 = inlined_call_operand.hbm [shape: f32[4,8,128], index: 1, kind: input, shape index: {}]   ;;  %s1698_s2 = inlined_call_operand.hbm [shape: f32[128,256], index: 2, kind: input, shape index: {}]   ;;  %s1699_s3 = inlined_call_operand.hbm [shape: f32[1,256], index: 3, kind: input, shape index: {}]   ;;  %s1700_s4 = inlined_call_operand.hbm [shape: f32[256,512], index: 4, kind: input, shape index: {}]   ;;  %s1701_s5 = inlined_call_operand.vmem [shape: f32[1,512], index: 5, kind: input, shape index: {}]   ;;  %s1702_s6 = inlined_call_operand.hbm [shape: f32[256,512], index: 6, kind: input, shape index: {}]   ;;  %s1703_s7 = inlined_call_operand.vmem [shape: f32[1,512], index: 7, kind: input, shape index: {}]   ;;  %s1704_s8 = inlined_call_operand.hbm [shape: f32[256,256], index: 8, kind: input, shape index: {}]   ;;  %s1705_s9 = inlined_call_operand.vmem [shape: f32[1,256], index: 9, kind: input, shape index: {}]   ;;  %s1706_s10 = inlined_call_operand.hbm [shape: f32[256,256], index: 10, kind: input, shape index: {}]   ;;  %s1707_s11 = inlined_call_operand.vmem [shape: f32[1,256], index: 11, kind: input, shape index: {}]   ;;  %s1708_s12 = inlined_call_operand.hbm [shape: f32[8,256], index: 12, kind: output, shape index: {}]  }
   0x1   :  { %18 = vsyncpa [#allocation6], 0 }
   0x2   :  { %19 = vsyncpa [#allocation9], 0 }
   0x3   :  { %20 = vsyncpa [#allocation12], 0 }
   0x4   :  { %21 = vsyncpa [#allocation15], 0 }
   0x5   :  { %22 = vsyncpa [#allocation4], 0  ;;  %s1502_s21 = smov [#allocation5]  }
   0x6   :  { %s38_s22 = sshll.u32 %s1502_s21, 4  ;;  %s39_s22 = int_to_ptr.vmem [resolvable:$true] %s38_s22 }
   0x7   :  { %s1318_s23 = scalar_lea.vmem %s39_s22, 512  ;;  %p1323_p1 = scmp.lt.s32.totalorder %s39_s22, %s39_s22 }
   0x8   :  { %p1319_p0 = scmp.ne.s32.totalorder %s39_s22, %s1318_s23  ;;  %p1324_p2 = scmp.lt.s32.totalorder %s1318_s23, %s1318_s23 }
   0xa   :  { %p1325_p3 = por %p1324_p2, %p1323_p1 }
   0xc   :  { %p1326_p4 = pnand %p1325_p3, %p1319_p0 }
   0xe   :  { %1329 = shalt.err (!%p1326_p4)
}
   0xf   :  { %s1503_s24 = smov 128   ;;  %s1504_s25 = smov 8  }
  0x10   :  { %44 = dma.hbm_to_vmem [thread:$0]  %s1697_s1, 512, %s39_s22, [#allocation6], %s1503_s24, %s1503_s24, %s1504_s25  }
  0x11   :  { %s1505_s28 = smov [#allocation8]  }
  0x12   :  { %s63_s29 = sshll.u32 %s1505_s28, 4  ;;  %s64_s29 = int_to_ptr.vmem [resolvable:$true] %s63_s29 }
  0x13   :  { %s1338_s30 = scalar_lea.vmem %s64_s29, 32  ;;  %p1343_p6 = scmp.lt.s32.totalorder %s64_s29, %s64_s29 }
  0x14   :  { %p1339_p5 = scmp.ne.s32.totalorder %s64_s29, %s1338_s30  ;;  %p1344_p7 = scmp.lt.s32.totalorder %s1338_s30, %s1338_s30 }
  0x16   :  { %p1345_p8 = por %p1344_p7, %p1343_p6 }
  0x18   :  { %p1346_p9 = pnand %p1345_p8, %p1339_p5 }
  0x1a   :  { %1349 = shalt.err (!%p1346_p9)
}
  0x1b   :  { %66 = dma.hbm_to_vmem [thread:$0]  %s1699_s3, 32, %s64_s29, [#allocation9]  }
  0x1c   :  { %s1506_s15 = smov [#allocation11]   ;;  %s1507_s17 = smov [#allocation2]  }
  0x1d   :  { %s86_s16 = sshll.u32 %s1506_s15, 4  ;;  %s29_s18 = sshll.u32 %s1507_s17, 4  ;;  %s87_s16 = int_to_ptr.vmem [resolvable:$true] %s86_s16  ;;  %s30_s18 = int_to_ptr.vmem [resolvable:$true] %s29_s18 }
  0x1e   :  { %s1358_s1 = scalar_lea.vmem %s87_s16, 16384  ;;  %p1363_p11 = scmp.lt.s32.totalorder %s87_s16, %s87_s16 }
  0x1f   :  { %p1359_p10 = scmp.ne.s32.totalorder %s87_s16, %s1358_s1  ;;  %p1364_p12 = scmp.lt.s32.totalorder %s1358_s1, %s1358_s1 }
  0x21   :  { %p1365_p13 = por %p1364_p12, %p1363_p11 }
  0x23   :  { %p1366_p0 = pnand %p1365_p13, %p1359_p10 }
  0x25   :  { %1369 = shalt.err (!%p1366_p0)
}
  0x26   :  { %s1508_s19 = smov 512   ;;  %s1509_s20 = smov 32  }
  0x27   :  { %92 = dma.hbm_to_vmem [thread:$0]  %s1702_s6, 16384, %s87_s16, [#allocation12], %s1508_s19, %s1508_s19, %s1509_s20  }
  0x28   :  { %s1378_s22 = scalar_lea.vmem %s30_s18, 256  ;;  %p1383_p2 = scmp.lt.s32.totalorder %s30_s18, %s30_s18 }
  0x29   :  { %p1379_p1 = scmp.ne.s32.totalorder %s30_s18, %s1378_s22  ;;  %p1384_p3 = scmp.lt.s32.totalorder %s1378_s22, %s1378_s22 }
  0x2b   :  { %p1385_p4 = por %p1384_p3, %p1383_p2 }
  0x2d   :  { %p1386_p5 = pnand %p1385_p4, %p1379_p1 }
  0x2f   :  { %1389 = shalt.err (!%p1386_p5)
}
  0x30   :  { %32 = dma.hbm_to_vmem [thread:$0]  %s1696_s0, 256, %s30_s18, [#allocation3]  }
  0x31   :  { %s1510_s25 = smov [#allocation7]  }
  0x32   :  { %s50_s26 = sshll.u32 %s1510_s25, 4  ;;  %s51_s26 = int_to_ptr.vmem [resolvable:$true] %s50_s26 }
  0x33   :  { %s1398_s27 = scalar_lea.vmem %s51_s26, 4096  ;;  %p1403_p7 = scmp.lt.s32.totalorder %s51_s26, %s51_s26 }
  0x34   :  { %p1399_p6 = scmp.ne.s32.totalorder %s51_s26, %s1398_s27  ;;  %p1404_p8 = scmp.lt.s32.totalorder %s1398_s27, %s1398_s27 }
  0x36   :  { %p1405_p9 = por %p1404_p8, %p1403_p7 }
  0x38   :  { %p1406_p10 = pnand %p1405_p9, %p1399_p6 }
  0x3a   :  { %1409 = shalt.err (!%p1406_p10)
}
  0x3b   :  { %s1511_s6 = smov 256   ;;  %s1512_s28 = smov 16  }
  0x3c   :  { %56 = dma.hbm_to_vmem [thread:$0]  %s1698_s2, 4096, %s51_s26, [#allocation6], %s1511_s6, %s1511_s6, %s1512_s28  }
  0x3d   :  { %s1513_s0 = smov [#allocation10]   ;;  %s1514_s14 = smov [#allocation13]  }
  0x3e   :  { %s72_s13 = sshll.u32 %s1513_s0, 4  ;;  %s100_s15 = sshll.u32 %s1514_s14, 4  ;;  %s73_s13 = int_to_ptr.vmem [resolvable:$true] %s72_s13  ;;  %s101_s15 = int_to_ptr.vmem [resolvable:$true] %s100_s15 }
  0x3f   :  { %s1418_s16 = scalar_lea.vmem %s73_s13, 16384  ;;  %p1423_p12 = scmp.lt.s32.totalorder %s73_s13, %s73_s13 }
  0x40   :  { %p1419_p11 = scmp.ne.s32.totalorder %s73_s13, %s1418_s16  ;;  %p1424_p13 = scmp.lt.s32.totalorder %s1418_s16, %s1418_s16 }
  0x42   :  { %p1425_p0 = por %p1424_p13, %p1423_p12 }
  0x44   :  { %p1426_p1 = pnand %p1425_p0, %p1419_p11 }
  0x46   :  { %1429 = shalt.err (!%p1426_p1)
}
  0x47   :  { %78 = dma.hbm_to_vmem [thread:$0]  %s1700_s4, 16384, %s73_s13, [#allocation9], %s1508_s19, %s1508_s19, %s1509_s20  }
  0x48   :  { %s1438_s2 = scalar_lea.vmem %s101_s15, 8192  ;;  %p1443_p3 = scmp.lt.s32.totalorder %s101_s15, %s101_s15 }
  0x49   :  { %p1439_p2 = scmp.ne.s32.totalorder %s101_s15, %s1438_s2  ;;  %p1444_p4 = scmp.lt.s32.totalorder %s1438_s2, %s1438_s2 }
  0x4b   :  { %p1445_p5 = por %p1444_p4, %p1443_p3 }
  0x4d   :  { %p1446_p6 = pnand %p1445_p5, %p1439_p2 }
  0x4f   :  { %1449 = shalt.err (!%p1446_p6)
}
  0x50   :  { %106 = dma.hbm_to_vmem [thread:$0]  %s1704_s8, 8192, %s101_s15, [#allocation12], %s1511_s6, %s1511_s6, %s1512_s28  }
  0x51   :  { %s1515_s3 = smov [#allocation14]  }
  0x52   :  { %s114_s22 = sshll.u32 %s1515_s3, 4  ;;  %s115_s22 = int_to_ptr.vmem [resolvable:$true] %s114_s22 }
  0x53   :  { %s1458_s23 = scalar_lea.vmem %s115_s22, 8192  ;;  %p1463_p8 = scmp.lt.s32.totalorder %s115_s22, %s115_s22 }
  0x54   :  { %p1459_p7 = scmp.ne.s32.totalorder %s115_s22, %s1458_s23  ;;  %p1464_p9 = scmp.lt.s32.totalorder %s1458_s23, %s1458_s23 }
  0x56   :  { %p1465_p10 = por %p1464_p9, %p1463_p8 }
  0x58   :  { %p1466_p11 = pnand %p1465_p10, %p1459_p7 }
  0x5a   :  { %1469 = shalt.err (!%p1466_p11)
}
  0x5b   :  { %120 = dma.hbm_to_vmem [thread:$0]  %s1706_s10, 8192, %s115_s22, [#allocation15], %s1511_s6, %s1511_s6, %s1512_s28  }
  0x5c   :  { %1490 = dma.done.wait [#allocation3], 256  }
  0x5d   :  { %1491 = vsyncadd [#allocation3], 4294967040 }
  0x5e   :  { %1492 = dma.done.wait [#allocation6], 4608  }
  0x5f   :  { %1493 = vsyncadd [#allocation6], 4294962688 }
  0x60   :  { %1494 = dma.done.wait [#allocation9], 16416  }
  0x61   :  { %1495 = vsyncadd [#allocation9], 4294950880 }
  0x62   :  { %1496 = dma.done.wait [#allocation12], 24576  }
  0x63   :  { %1497 = vsyncadd [#allocation12], 4294942720 }
  0x64   :  { %1498 = dma.done.wait [#allocation15], 8192  }
  0x65   :  { %1499 = vsyncadd [#allocation15], 4294959104  ;;  %v1516_v0 = vmov 0.0   ;;  %v184_v1 = vld [vmem:[#allocation7 + $0xf8] sm:$0xff]  ;;  %v183_v2 = vld [vmem:[#allocation7 + $0xf0] sm:$0xff] }
  0x66   :  { %261 = vmatprep.mubr.f32.mxu0 %v1516_v0  ;;  %v182_v3 = vld [vmem:[#allocation7 + $0xe8] sm:$0xff]  ;;  %197 = vmatprep.subr.mxu0 %v184_v1  ;;  %v181_v4 = vld [vmem:[#allocation7 + $0xe0] sm:$0xff]  ;;  %v180_v5 = vld [vmem:[#allocation7 + $0xd8] sm:$0xff] }
  0x67   :  { %198 = vmatpush1.msra.mxu0 %v183_v2  ;;  %v179_v6 = vld [vmem:[#allocation7 + $0xd0] sm:$0xff]  ;;  %v178_v7 = vld [vmem:[#allocation7 + $0xc8] sm:$0xff]  ;;  %v177_v8 = vld [vmem:[#allocation7 + $0xc0] sm:$0xff] }
  0x68   :  { %199 = vmatprep.subr.mxu0 %v182_v3  ;;  %v176_v9 = vld [vmem:[#allocation7 + $0xb8] sm:$0xff]  ;;  %v175_v10 = vld [vmem:[#allocation7 + $0xb0] sm:$0xff]  ;;  %v174_v11 = vld [vmem:[#allocation7 + $0xa8] sm:$0xff] }
  0x69   :  { %200 = vmatpush1.msra.mxu0 %v181_v4  ;;  %v173_v12 = vld [vmem:[#allocation7 + $0xa0] sm:$0xff]  ;;  %v172_v13 = vld [vmem:[#allocation7 + $0x98] sm:$0xff]  ;;  %v171_v14 = vld [vmem:[#allocation7 + $0x90] sm:$0xff] }
  0x6a   :  { %201 = vmatprep.subr.mxu0 %v180_v5  ;;  %v170_v15 = vld [vmem:[#allocation7 + $0x88] sm:$0xff]  ;;  %v169_v18 = vld [vmem:[#allocation7 + $0x80] sm:$0xff]  ;;  %v168_v21 = vld [vmem:[#allocation7 + $0x78] sm:$0xff] }
  0x6b   :  { %202 = vmatpush1.msra.mxu0 %v179_v6  ;;  %v347_v16 = vld [vmem:[#allocation10 + $0x1e8] sm:$0xff]  ;;  %v346_v17 = vld [vmem:[#allocation10 + $0x1e0] sm:$0xff]  ;;  %v164_v29 = vld [vmem:[#allocation7 + $0x58] sm:$0xff] }
  0x6c   :  { %203 = vmatprep.subr.mxu0 %v178_v7  ;;  %436 = vmatprep.subr.mxu1 %v347_v16  ;;  %v343_v19 = vld [vmem:[#allocation10 + $0x1c8] sm:$0xff]  ;;  %v342_v20 = vld [vmem:[#allocation10 + $0x1c0] sm:$0xff]  ;;  %v160_v37 = vld [vmem:[#allocation7 + $0x38] sm:$0xff] }
  0x6d   :  { %204 = vmatpush1.msra.mxu0 %v177_v8  ;;  %437 = vmatpush1.msra.mxu1 %v346_v17  ;;  %v339_v22 = vld [vmem:[#allocation10 + $0x1a8] sm:$0xff]  ;;  %v338_v24 = vld [vmem:[#allocation10 + $0x1a0] sm:$0xff]  ;;  %v156_v45 = vld [vmem:[#allocation7 + $0x18] sm:$0xff] }
  0x6e   :  { %205 = vmatprep.subr.mxu0 %v176_v9  ;;  %v167_v23 = vld [vmem:[#allocation7 + $0x70] sm:$0xff]  ;;  %438 = vmatprep.subr.mxu1 %v343_v19  ;;  %v166_v25 = vld [vmem:[#allocation7 + $0x68] sm:$0xff]  ;;  %v165_v27 = vld [vmem:[#allocation7 + $0x60] sm:$0xff] }
  0x6f   :  { %206 = vmatpush1.msra.mxu0 %v175_v10  ;;  %439 = vmatpush1.msra.mxu1 %v342_v20  ;;  %v335_v26 = vld [vmem:[#allocation10 + $0x188] sm:$0xff]  ;;  %v334_v28 = vld [vmem:[#allocation10 + $0x180] sm:$0xff]  ;;  %v349_v54 = vld [vmem:[#allocation10 + $0x1f8] sm:$0xff] }
  0x70   :  { %207 = vmatprep.subr.mxu0 %v174_v11  ;;  %440 = vmatprep.subr.mxu1 %v339_v22  ;;  %v331_v30 = vld [vmem:[#allocation10 + $0x168] sm:$0xff]  ;;  %v330_v32 = vld [vmem:[#allocation10 + $0x160] sm:$0xff]  ;;  %v348_v55 = vld [vmem:[#allocation10 + $0x1f0] sm:$0xff] }
  0x71   :  { %208 = vmatpush1.msra.mxu0 %v173_v12  ;;  %441 = vmatpush1.msra.mxu1 %v338_v24  ;;  %v163_v31 = vld [vmem:[#allocation7 + $0x50] sm:$0xff]  ;;  %v162_v33 = vld [vmem:[#allocation7 + $0x48] sm:$0xff]  ;;  %v161_v35 = vld [vmem:[#allocation7 + $0x40] sm:$0xff] }
  0x72   :  { %209 = vmatprep.subr.mxu0 %v172_v13  ;;  %442 = vmatprep.subr.mxu1 %v335_v26  ;;  %v327_v34 = vld [vmem:[#allocation10 + $0x148] sm:$0xff]  ;;  %v326_v36 = vld [vmem:[#allocation10 + $0x140] sm:$0xff]  ;;  %v345_v56 = vld [vmem:[#allocation10 + $0x1d8] sm:$0xff] }
  0x73   :  { %210 = vmatpush1.msra.mxu0 %v171_v14  ;;  %443 = vmatpush1.msra.mxu1 %v334_v28  ;;  %v323_v38 = vld [vmem:[#allocation10 + $0x128] sm:$0xff]  ;;  %v322_v40 = vld [vmem:[#allocation10 + $0x120] sm:$0xff]  ;;  %v344_v58 = vld [vmem:[#allocation10 + $0x1d0] sm:$0xff] }
  0x74   :  { %211 = vmatprep.subr.mxu0 %v170_v15  ;;  %444 = vmatprep.subr.mxu1 %v331_v30  ;;  %v159_v39 = vld [vmem:[#allocation7 + $0x30] sm:$0xff]  ;;  %v158_v41 = vld [vmem:[#allocation7 + $0x28] sm:$0xff]  ;;  %v157_v43 = vld [vmem:[#allocation7 + $0x20] sm:$0xff] }
  0x75   :  { %212 = vmatpush1.msra.mxu0 %v169_v18  ;;  %445 = vmatpush1.msra.mxu1 %v330_v32  ;;  %v319_v42 = vld [vmem:[#allocation10 + $0x108] sm:$0xff]  ;;  %v318_v44 = vld [vmem:[#allocation10 + $0x100] sm:$0xff]  ;;  %v341_v61 = vld [vmem:[#allocation10 + $0x1b8] sm:$0xff] }
  0x76   :  { %213 = vmatprep.subr.mxu0 %v168_v21  ;;  %446 = vmatprep.subr.mxu1 %v327_v34  ;;  %v315_v46 = vld [vmem:[#allocation10 + $0xe8] sm:$0xff]  ;;  %v314_v48 = vld [vmem:[#allocation10 + $0xe0] sm:$0xff]  ;;  %v340_v62 = vld [vmem:[#allocation10 + $0x1b0] sm:$0xff] }
  0x77   :  { %214 = vmatpush1.msra.mxu0 %v167_v23  ;;  %447 = vmatpush1.msra.mxu1 %v326_v36  ;;  %v155_v47 = vld [vmem:[#allocation7 + $0x10] sm:$0xff]  ;;  %v154_v49 = vld [vmem:[#allocation7 + $0x8] sm:$0xff]  ;;  %v153_v51 = vld [vmem:[#allocation7] sm:$0xff] }
  0x78   :  { %215 = vmatprep.subr.mxu0 %v166_v25  ;;  %448 = vmatprep.subr.mxu1 %v323_v38  ;;  %v311_v50 = vld [vmem:[#allocation10 + $0xc8] sm:$0xff]  ;;  %v310_v52 = vld [vmem:[#allocation10 + $0xc0] sm:$0xff]  ;;  %v337_v63 = vld [vmem:[#allocation10 + $0x198] sm:$0xff] }
  0x79   :  { %216 = vmatpush1.msra.mxu0 %v165_v27  ;;  %449 = vmatpush1.msra.mxu1 %v322_v40  ;;  %v149_v53 = vld [vmem:[#allocation5] sm:$0xff]  ;;  %v307_v57 = vld [vmem:[#allocation10 + $0xa8] sm:$0xff]  ;;  %v336_v2 = vld [vmem:[#allocation10 + $0x190] sm:$0xff] }
  0x7a   :  { %217 = vmatprep.subr.mxu0 %v164_v29  ;;  %450 = vmatprep.subr.mxu1 %v319_v42  ;;  %v306_v59 = vld [vmem:[#allocation10 + $0xa0] sm:$0xff]  ;;  %v303_v1 = vld [vmem:[#allocation10 + $0x88] sm:$0xff]  ;;  %v333_v5 = vld [vmem:[#allocation10 + $0x178] sm:$0xff] }
  0x7b   :  { %218 = vmatpush1.msra.mxu0 %v163_v31  ;;  %451 = vmatpush1.msra.mxu1 %v318_v44  ;;  %v150_v60 = vld [vmem:[#allocation5 + $0x8] sm:$0xff]  ;;  %v151_v4 = vld [vmem:[#allocation5 + $0x10] sm:$0xff]  ;;  %v329_v7 = vld [vmem:[#allocation10 + $0x158] sm:$0xff] }
  0x7c   :  { %219 = vmatprep.subr.mxu0 %v162_v33  ;;  %452 = vmatprep.subr.mxu1 %v315_v46  ;;  %v302_v3 = vld [vmem:[#allocation10 + $0x80] sm:$0xff]  ;;  %v332_v6 = vld [vmem:[#allocation10 + $0x170] sm:$0xff]  ;;  %v299_v8 = vld [vmem:[#allocation10 + $0x68] sm:$0xff] }
  0x7d   :  { %220 = vmatpush1.msra.mxu0 %v161_v35  ;;  %453 = vmatpush1.msra.mxu1 %v314_v48  ;;  %v328_v9 = vld [vmem:[#allocation10 + $0x150] sm:$0xff]  ;;  %v298_v10 = vld [vmem:[#allocation10 + $0x60] sm:$0xff]  ;;  %v325_v12 = vld [vmem:[#allocation10 + $0x138] sm:$0xff] }
  0x7e   :  { %221 = vmatprep.subr.mxu0 %v160_v37  ;;  %454 = vmatprep.subr.mxu1 %v311_v50  ;;  %v152_v11 = vld [vmem:[#allocation5 + $0x18] sm:$0xff]  ;;  %v295_v14 = vld [vmem:[#allocation10 + $0x48] sm:$0xff]  ;;  %v294_v16 = vld [vmem:[#allocation10 + $0x40] sm:$0xff] }
  0x7f   :  { %222 = vmatpush1.msra.mxu0 %v159_v39  ;;  %455 = vmatpush1.msra.mxu1 %v310_v52  ;;  %v324_v13 = vld [vmem:[#allocation10 + $0x130] sm:$0xff]  ;;  %v321_v15 = vld [vmem:[#allocation10 + $0x118] sm:$0xff]  ;;  %v291_v18 = vld [vmem:[#allocation10 + $0x28] sm:$0xff] }
  0x80   :  { %223 = vmatprep.subr.mxu0 %v158_v41  ;;  %456 = vmatprep.subr.mxu1 %v307_v57  ;;  %v320_v17 = vld [vmem:[#allocation10 + $0x110] sm:$0xff]  ;;  %v317_v19 = vld [vmem:[#allocation10 + $0xf8] sm:$0xff]  ;;  %v290_v20 = vld [vmem:[#allocation10 + $0x20] sm:$0xff] }
  0x81   :  { %224 = vmatpush1.msra.mxu0 %v157_v43  ;;  %457 = vmatpush1.msra.mxu1 %v306_v59  ;;  %v287_v21 = vld [vmem:[#allocation10 + $0x8] sm:$0xff]  ;;  %v313_v22 = vld [vmem:[#allocation10 + $0xd8] sm:$0xff]  ;;  %v286_v23 = vld [vmem:[#allocation10] sm:$0xff] }
  0x82   :  { %225 = vmatprep.subr.mxu0 %v156_v45  ;;  %458 = vmatprep.subr.mxu1 %v303_v1  ;;  %v312_v24 = vld [vmem:[#allocation10 + $0xd0] sm:$0xff]  ;;  %v411_v25 = vld [vmem:[#allocation10 + $0x3e8] sm:$0xff]  ;;  %v309_v26 = vld [vmem:[#allocation10 + $0xb8] sm:$0xff] }
  0x83   :  { %226 = vmatpush1.msra.mxu0 %v155_v47  ;;  %459 = vmatpush1.msra.mxu1 %v302_v3  ;;  %v410_v27 = vld [vmem:[#allocation10 + $0x3e0] sm:$0xff]  ;;  %v308_v28 = vld [vmem:[#allocation10 + $0xb0] sm:$0xff]  ;;  %v407_v29 = vld [vmem:[#allocation10 + $0x3c8] sm:$0xff] }
  0x84   :  { %227 = vmatprep.subr.mxu0 %v154_v49  ;;  %460 = vmatprep.subr.mxu1 %v299_v8  ;;  %v305_v30 = vld [vmem:[#allocation10 + $0x98] sm:$0xff]  ;;  %v406_v31 = vld [vmem:[#allocation10 + $0x3c0] sm:$0xff]  ;;  %v304_v32 = vld [vmem:[#allocation10 + $0x90] sm:$0xff] }
  0x85   :  { %228 = vmatpush1.msra.mxu0 %v153_v51  ;;  %461 = vmatpush1.msra.mxu1 %v298_v10  ;;  %v403_v33 = vld [vmem:[#allocation10 + $0x3a8] sm:$0xff]  ;;  %v301_v34 = vld [vmem:[#allocation10 + $0x78] sm:$0xff]  ;;  %v402_v35 = vld [vmem:[#allocation10 + $0x3a0] sm:$0xff] }
  0x86   :  { %262 = vmatmul.mubr.f32.vlgmr.msra.gmra.mxu0 %v149_v53  ;;  %525 = vmatprep.subr.mxu0 %v349_v54  ;;  %v300_v36 = vld [vmem:[#allocation10 + $0x70] sm:$0xff]  ;;  %v399_v37 = vld [vmem:[#allocation10 + $0x388] sm:$0xff]  ;;  %v297_v38 = vld [vmem:[#allocation10 + $0x58] sm:$0xff] }
  0x87   :  { %267 = vmatprep.mubr.f32.mxu0 %v1516_v0  ;;  %526 = vmatpush1.msra.mxu0 %v348_v55  ;;  %v398_v39 = vld [vmem:[#allocation10 + $0x380] sm:$0xff]  ;;  %v296_v40 = vld [vmem:[#allocation10 + $0x50] sm:$0xff]  ;;  %v395_v41 = vld [vmem:[#allocation10 + $0x368] sm:$0xff] }
  0x88   :  { %527 = vmatprep.subr.mxu0 %v345_v56  ;;  %462 = vmatprep.subr.mxu1 %v295_v14  ;;  %v293_v42 = vld [vmem:[#allocation10 + $0x38] sm:$0xff]  ;;  %v394_v43 = vld [vmem:[#allocation10 + $0x360] sm:$0xff]  ;;  %v292_v44 = vld [vmem:[#allocation10 + $0x30] sm:$0xff] }
  0x89   :  { %528 = vmatpush1.msra.mxu0 %v344_v58  ;;  %463 = vmatpush1.msra.mxu1 %v294_v16  ;;  %v391_v45 = vld [vmem:[#allocation10 + $0x348] sm:$0xff]  ;;  %v289_v46 = vld [vmem:[#allocation10 + $0x18] sm:$0xff]  ;;  %v390_v47 = vld [vmem:[#allocation10 + $0x340] sm:$0xff] }
  0x8a   :  { %268 = vmatmul.mubr.f32.gmra.mxu0 %v150_v60  ;;  %529 = vmatprep.subr.mxu0 %v341_v61  ;;  %v288_v48 = vld [vmem:[#allocation10 + $0x10] sm:$0xff]  ;;  %v387_v49 = vld [vmem:[#allocation10 + $0x328] sm:$0xff]  ;;  %v413_v50 = vld [vmem:[#allocation10 + $0x3f8] sm:$0xff] }
  0x8b   :  { %273 = vmatprep.mubr.f32.mxu0 %v1516_v0  ;;  %530 = vmatpush1.msra.mxu0 %v340_v62  ;;  %v386_v51 = vld [vmem:[#allocation10 + $0x320] sm:$0xff]  ;;  %v412_v52 = vld [vmem:[#allocation10 + $0x3f0] sm:$0xff]  ;;  %v383_v53 = vld [vmem:[#allocation10 + $0x308] sm:$0xff] }
  0x8c   :  { %531 = vmatprep.subr.mxu0 %v337_v63  ;;  %464 = vmatprep.subr.mxu1 %v291_v18  ;;  %v409_v54 = vld [vmem:[#allocation10 + $0x3d8] sm:$0xff]  ;;  %v382_v55 = vld [vmem:[#allocation10 + $0x300] sm:$0xff]  ;;  %v408_v56 = vld [vmem:[#allocation10 + $0x3d0] sm:$0xff] }
  0x8d   :  { %532 = vmatpush1.msra.mxu0 %v336_v2  ;;  %465 = vmatpush1.msra.mxu1 %v290_v20  ;;  %v379_v57 = vld [vmem:[#allocation10 + $0x2e8] sm:$0xff]  ;;  %v405_v58 = vld [vmem:[#allocation10 + $0x3b8] sm:$0xff]  ;;  %v378_v59 = vld [vmem:[#allocation10 + $0x2e0] sm:$0xff] }
  0x8e   :  { %274 = vmatmul.mubr.f32.gmra.mxu0 %v151_v4  ;;  %533 = vmatprep.subr.mxu0 %v333_v5  ;;  %v404_v60 = vld [vmem:[#allocation10 + $0x3b0] sm:$0xff]  ;;  %v375_v61 = vld [vmem:[#allocation10 + $0x2c8] sm:$0xff]  ;;  %v401_v62 = vld [vmem:[#allocation10 + $0x398] sm:$0xff] }
  0x8f   :  { %279 = vmatprep.mubr.f32.mxu0 %v1516_v0  ;;  %534 = vmatpush1.msra.mxu0 %v332_v6  ;;  %v316_v0 = vld [vmem:[#allocation10 + $0xf0] sm:$0xff]  ;;  %v374_v63 = vld [vmem:[#allocation10 + $0x2c0] sm:$0xff]  ;;  %v371_v2 = vld [vmem:[#allocation10 + $0x2a8] sm:$0xff] }
  0x90   :  { %535 = vmatprep.subr.mxu0 %v329_v7  ;;  %466 = vmatprep.subr.mxu1 %v287_v21  ;;  %v400_v1 = vld [vmem:[#allocation10 + $0x390] sm:$0xff]  ;;  %v397_v3 = vld [vmem:[#allocation10 + $0x378] sm:$0xff]  ;;  %v370_v4 = vld [vmem:[#allocation10 + $0x2a0] sm:$0xff] }
  0x91   :  { %536 = vmatpush1.msra.mxu0 %v328_v9  ;;  %467 = vmatpush1.msra.mxu1 %v286_v23  ;;  %v396_v5 = vld [vmem:[#allocation10 + $0x370] sm:$0xff]  ;;  %v367_v6 = vld [vmem:[#allocation10 + $0x288] sm:$0xff]  ;;  %v393_v7 = vld [vmem:[#allocation10 + $0x358] sm:$0xff] }
  0x92   :  { %280 = vmatmul.mubr.f32.gmra.mxu0 %v152_v11  ;;  %537 = vmatprep.subr.mxu0 %v325_v12  ;;  %v366_v8 = vld [vmem:[#allocation10 + $0x280] sm:$0xff]  ;;  %v392_v9 = vld [vmem:[#allocation10 + $0x350] sm:$0xff]  ;;  %v363_v10 = vld [vmem:[#allocation10 + $0x268] sm:$0xff] }
  0x93   :  { %538 = vmatpush1.msra.mxu0 %v324_v13  ;;  %468 = vmatprep.subr.mxu1 %v411_v25  ;;  %v389_v11 = vld [vmem:[#allocation10 + $0x338] sm:$0xff]  ;;  %v362_v12 = vld [vmem:[#allocation10 + $0x260] sm:$0xff]  ;;  %v388_v13 = vld [vmem:[#allocation10 + $0x330] sm:$0xff] }
  0x94   :  { %539 = vmatprep.subr.mxu0 %v321_v15  ;;  %469 = vmatpush2.msra.mxu1 %v410_v27  ;;  %v359_v14 = vld [vmem:[#allocation10 + $0x248] sm:$0xff]  ;;  %v385_v15 = vld [vmem:[#allocation10 + $0x318] sm:$0xff]  ;;  %v384_v16 = vld [vmem:[#allocation10 + $0x310] sm:$0xff] }
  0x95   :  { %540 = vmatpush1.msra.mxu0 %v320_v17  ;;  %470 = vmatprep.subr.mxu1 %v407_v29  ;;  %v381_v17 = vld [vmem:[#allocation10 + $0x2f8] sm:$0xff]  ;;  %v380_v18 = vld [vmem:[#allocation10 + $0x2f0] sm:$0xff] }
  0x96   :  { %541 = vmatprep.subr.mxu0 %v317_v19  ;;  %471 = vmatpush2.msra.mxu1 %v406_v31  ;;  %v377_v19 = vld [vmem:[#allocation10 + $0x2d8] sm:$0xff]  ;;  %v376_v20 = vld [vmem:[#allocation10 + $0x2d0] sm:$0xff] }
  0x97   :  { %542 = vmatpush1.msra.mxu0 %v316_v0  ;;  %472 = vmatprep.subr.mxu1 %v403_v33  ;;  %v373_v0 = vld [vmem:[#allocation10 + $0x2b8] sm:$0xff]  ;;  %v372_v21 = vld [vmem:[#allocation10 + $0x2b0] sm:$0xff] }
  0x98   :  { %543 = vmatprep.subr.mxu0 %v313_v22  ;;  %473 = vmatpush2.msra.mxu1 %v402_v35  ;;  %v369_v22 = vld [vmem:[#allocation10 + $0x298] sm:$0xff]  ;;  %v368_v23 = vld [vmem:[#allocation10 + $0x290] sm:$0xff] }
  0x99   :  { %544 = vmatpush1.msra.mxu0 %v312_v24  ;;  %474 = vmatprep.subr.mxu1 %v399_v37  ;;  %v365_v24 = vld [vmem:[#allocation10 + $0x278] sm:$0xff]  ;;  %v364_v25 = vld [vmem:[#allocation10 + $0x270] sm:$0xff]  ;;  %v675_v37 = vld [vmem:[#allocation11 + $0x1e8] sm:$0xff] }
  0x9a   :  { %545 = vmatprep.subr.mxu0 %v309_v26  ;;  %475 = vmatpush2.msra.mxu1 %v398_v39  ;;  %v358_v26 = vld [vmem:[#allocation10 + $0x240] sm:$0xff]  ;;  %v361_v27 = vld [vmem:[#allocation10 + $0x258] sm:$0xff]  ;;  %v360_v29 = vld [vmem:[#allocation10 + $0x250] sm:$0xff] }
  0x9b   :  { %546 = vmatpush1.msra.mxu0 %v308_v28  ;;  %476 = vmatprep.subr.mxu1 %v395_v41  ;;  %v355_v28 = vld [vmem:[#allocation10 + $0x228] sm:$0xff]  ;;  %v357_v31 = vld [vmem:[#allocation10 + $0x238] sm:$0xff]  ;;  %v356_v33 = vld [vmem:[#allocation10 + $0x230] sm:$0xff] }
  0x9c   :  { %547 = vmatprep.subr.mxu0 %v305_v30  ;;  %477 = vmatpush2.msra.mxu1 %v394_v43  ;;  %v354_v30 = vld [vmem:[#allocation10 + $0x220] sm:$0xff]  ;;  %v353_v35 = vld [vmem:[#allocation10 + $0x218] sm:$0xff] }
  0x9d   :  { %548 = vmatpush1.msra.mxu0 %v304_v32  ;;  %478 = vmatprep.subr.mxu1 %v391_v45  ;;  %v351_v32 = vld [vmem:[#allocation10 + $0x208] sm:$0xff] }
  0x9e   :  { %549 = vmatprep.subr.mxu0 %v301_v34  ;;  %479 = vmatpush2.msra.mxu1 %v390_v47  ;;  %v350_v34 = vld [vmem:[#allocation10 + $0x200] sm:$0xff] }
  0x9f   :  { %550 = vmatpush1.msra.mxu0 %v300_v36  ;;  %480 = vmatprep.subr.mxu1 %v387_v49  ;;  %v352_v36 = vld [vmem:[#allocation10 + $0x210] sm:$0xff]  ;;  %v674_v49 = vld [vmem:[#allocation11 + $0x1e0] sm:$0xff] }
  0xa0   :  { %551 = vmatprep.subr.mxu0 %v297_v38  ;;  %481 = vmatpush2.msra.mxu1 %v386_v51  ;;  %v187_v38 = vlaneseq  ;;  %v671_v51 = vld [vmem:[#allocation11 + $0x1c8] sm:$0xff] }
  0xa1   :  { %552 = vmatpush1.msra.mxu0 %v296_v40  ;;  %482 = vmatprep.subr.mxu1 %v383_v53 }
  0xa2   :  { %553 = vmatprep.subr.mxu0 %v293_v42  ;;  %483 = vmatpush2.msra.mxu1 %v382_v55  ;;  %v1626_v39 = vshrl.u32 %v187_v38, 7  ;;  %v185_v42 = vld [vmem:[#allocation8] sm:$0x3]  ;;  %v722_v38 = vld [vmem:[#allocation11 + $0x360] sm:$0xff] }
  0xa3   :  { %554 = vmatpush1.msra.mxu0 %v292_v44  ;;  %484 = vmatprep.subr.mxu1 %v379_v57  ;;  %v666_v57 = vld [vmem:[#allocation11 + $0x1a0] sm:$0xff] }
  0xa4   :  { %555 = vmatprep.subr.mxu0 %v289_v46  ;;  %485 = vmatpush2.msra.mxu1 %v378_v59  ;;  %v1629_v40 = vsub.s32 1, %v1626_v39  ;;  %v1632_v41 = vsub.s32 0, %v1626_v39  ;;  %v663_v59 = vld [vmem:[#allocation11 + $0x188] sm:$0xff] }
  0xa5   :  { %556 = vmatpush1.msra.mxu0 %v288_v48  ;;  %486 = vmatprep.subr.mxu1 %v375_v61 }
  0xa6   :  { %557 = vmatprep.subr.mxu0 %v413_v50  ;;  %487 = vmatpush2.msra.mxu1 %v374_v63  ;;  %v194_v43 = vrot.slane %v185_v42, %v1629_v40  ;;  %v190_v44 = vrot.slane %v185_v42, %v1632_v41  ;;  %v719_v42 = vld [vmem:[#allocation11 + $0x348] sm:$0xff] }
  0xa7   :  { %558 = vmatpush2.msra.mxu0 %v412_v52  ;;  %488 = vmatprep.subr.mxu1 %v371_v2  ;;  %v670_v52 = vld [vmem:[#allocation11 + $0x1c0] sm:$0xff] }
  0xa8   :  { %559 = vmatprep.subr.mxu0 %v409_v54  ;;  %489 = vmatpush2.msra.mxu1 %v370_v4  ;;  %v667_v54 = vld [vmem:[#allocation11 + $0x1a8] sm:$0xff]  ;;  %v658_v2 = vld [vmem:[#allocation11 + $0x160] sm:$0xff] }
  0xa9   :  { %560 = vmatpush2.msra.mxu0 %v408_v56  ;;  %490 = vmatprep.subr.mxu1 %v367_v6  ;;  %v655_v4 = vld [vmem:[#allocation11 + $0x148] sm:$0xff] }
  0xaa   :  { %561 = vmatprep.subr.mxu0 %v405_v58  ;;  %491 = vmatpush2.msra.mxu1 %v366_v8 }
  0xab   :  { %562 = vmatpush2.msra.mxu0 %v404_v60  ;;  %492 = vmatprep.subr.mxu1 %v363_v10  ;;  %v662_v60 = vld [vmem:[#allocation11 + $0x180] sm:$0xff] }
  0xac   :  { %563 = vmatprep.subr.mxu0 %v401_v62  ;;  %493 = vmatpush2.msra.mxu1 %v362_v12  ;;  %v659_v62 = vld [vmem:[#allocation11 + $0x168] sm:$0xff]  ;;  %v650_v10 = vld [vmem:[#allocation11 + $0x120] sm:$0xff] }
  0xad   :  { %564 = vmatpush2.msra.mxu0 %v400_v1  ;;  %494 = vmatprep.subr.mxu1 %v359_v14  ;;  %v646_v12 = vld [vmem:[#allocation11 + $0x100] sm:$0xff]  ;;  %v643_v14 = vld [vmem:[#allocation11 + $0xe8] sm:$0xff] }
  0xae   :  { %565 = vmatprep.subr.mxu0 %v397_v3  ;;  %495 = vmatpush2.msra.mxu1 %v358_v26  ;;  %v618_v26 = vld [vmem:[#allocation11 + $0x20] sm:$0xff] }
  0xaf   :  { %566 = vmatpush2.msra.mxu0 %v396_v5  ;;  %496 = vmatprep.subr.mxu1 %v355_v28  ;;  %v654_v5 = vld [vmem:[#allocation11 + $0x140] sm:$0xff] }
  0xb0   :  { %567 = vmatprep.subr.mxu0 %v393_v7  ;;  %497 = vmatpush2.msra.mxu1 %v354_v30  ;;  %v651_v7 = vld [vmem:[#allocation11 + $0x128] sm:$0xff]  ;;  %v614_v28 = vld [vmem:[#allocation11] sm:$0xff] }
  0xb1   :  { %568 = vmatpush2.msra.mxu0 %v392_v9  ;;  %498 = vmatprep.subr.mxu1 %v351_v32  ;;  %v738_v30 = vld [vmem:[#allocation11 + $0x3e0] sm:$0xff] }
  0xb2   :  { %569 = vmatprep.subr.mxu0 %v389_v11  ;;  %499 = vmatpush2.msra.mxu1 %v350_v34  ;;  %v647_v11 = vld [vmem:[#allocation11 + $0x108] sm:$0xff]  ;;  %v734_v32 = vld [vmem:[#allocation11 + $0x3c0] sm:$0xff] }
  0xb3   :  { %570 = vmatpush2.msra.mxu0 %v388_v13  ;;  %764 = vmatprep.subr.mxu1 %v675_v37  ;;  %v148_v13 = vld [vmem:[#allocation2 + $0x8] sm:$0xff]  ;;  %v730_v34 = vld [vmem:[#allocation11 + $0x3a0] sm:$0xff]  ;;  %v723_v37 = vld [vmem:[#allocation11 + $0x368] sm:$0xff] }
  0xb4   :  { %571 = vmatprep.subr.mxu0 %v385_v15  ;;  %v642_v15 = vld [vmem:[#allocation11 + $0xe0] sm:$0xff] }
  0xb5   :  { %572 = vmatpush2.msra.mxu0 %v384_v16  ;;  %v639_v16 = vld [vmem:[#allocation11 + $0xc8] sm:$0xff] }
  0xb6   :  { %573 = vmatprep.subr.mxu0 %v381_v17  ;;  %v638_v17 = vld [vmem:[#allocation11 + $0xc0] sm:$0xff] }
  0xb7   :  { %574 = vmatpush2.msra.mxu0 %v380_v18  ;;  %v635_v18 = vld [vmem:[#allocation11 + $0xa8] sm:$0xff] }
  0xb8   :  { %575 = vmatprep.subr.mxu0 %v377_v19  ;;  %v634_v19 = vld [vmem:[#allocation11 + $0xa0] sm:$0xff] }
  0xb9   :  { %576 = vmatpush2.msra.mxu0 %v376_v20  ;;  %v631_v20 = vld [vmem:[#allocation11 + $0x88] sm:$0xff] }
  0xba   :  { %577 = vmatprep.subr.mxu0 %v373_v0  ;;  %v630_v0 = vld [vmem:[#allocation11 + $0x80] sm:$0xff] }
  0xbb   :  { %578 = vmatpush2.msra.mxu0 %v372_v21  ;;  %v627_v21 = vld [vmem:[#allocation11 + $0x68] sm:$0xff] }
  0xbc   :  { %579 = vmatprep.subr.mxu0 %v369_v22  ;;  %v626_v22 = vld [vmem:[#allocation11 + $0x60] sm:$0xff] }
  0xbd   :  { %580 = vmatpush2.msra.mxu0 %v368_v23  ;;  %v623_v23 = vld [vmem:[#allocation11 + $0x48] sm:$0xff] }
  0xbe   :  { %581 = vmatprep.subr.mxu0 %v365_v24  ;;  %v622_v24 = vld [vmem:[#allocation11 + $0x40] sm:$0xff] }
  0xbf   :  { %582 = vmatpush2.msra.mxu0 %v364_v25  ;;  %v619_v25 = vld [vmem:[#allocation11 + $0x28] sm:$0xff] }
  0xc0   :  { %583 = vmatprep.subr.mxu0 %v361_v27  ;;  %v615_v27 = vld [vmem:[#allocation11 + $0x8] sm:$0xff] }
  0xc1   :  { %584 = vmatpush2.msra.mxu0 %v360_v29  ;;  %v739_v29 = vld [vmem:[#allocation11 + $0x3e8] sm:$0xff] }
  0xc2   :  { %585 = vmatprep.subr.mxu0 %v357_v31  ;;  %v735_v31 = vld [vmem:[#allocation11 + $0x3c8] sm:$0xff] }
  0xc3   :  { %586 = vmatpush2.msra.mxu0 %v356_v33  ;;  %v731_v33 = vld [vmem:[#allocation11 + $0x3a8] sm:$0xff] }
  0xc4   :  { %587 = vmatprep.subr.mxu0 %v353_v35  ;;  %v727_v35 = vld [vmem:[#allocation11 + $0x388] sm:$0xff] }
  0xc5   :  { %588 = vmatpush2.msra.mxu0 %v352_v36  ;;  %v726_v36 = vld [vmem:[#allocation11 + $0x380] sm:$0xff] }
 0x146   :  { %v263_v45 = vpop.f32.mrf.mxu0 }
 0x147   :  { %v264_v48 = vadd.f32 %v263_v45, %v190_v44  ;;  %v714_v45 = vld [vmem:[#allocation11 + $0x320] sm:$0xff] }
 0x148   :  { %v265_v46 = vpop.f32.mrf.mxu0 }
 0x149   :  { %v266_v47 = vadd.f32 %v265_v46, %v194_v43  ;;  %v711_v46 = vld [vmem:[#allocation11 + $0x308] sm:$0xff] }
 0x14a   :  { %v269_v50 = vpop.f32.mrf.mxu0 }
 0x14b   :  { %500 = vmatprep.mubr.f32.mxu1 %v266_v47  ;;  %589 = vmatprep.mubr.f32.mxu0 %v266_v47  ;;  %v270_v55 = vadd.f32 %v269_v50, %v190_v44  ;;  %v710_v47 = vld [vmem:[#allocation11 + $0x300] sm:$0xff]  ;;  %v703_v50 = vld [vmem:[#allocation11 + $0x2c8] sm:$0xff] }
 0x14c   :  { %501 = vmatmul.mubr.f32.vlgmr.msra.gmra.mxu1 %v264_v48  ;;  %590 = vmatmul.mubr.f32.vlgmr.msra.gmra.mxu0 %v264_v48  ;;  %v271_v53 = vpop.f32.mrf.mxu0  ;;  %v707_v48 = vld [vmem:[#allocation11 + $0x2e8] sm:$0xff] }
 0x14d   :  { %765 = vmatpush1.msra.mxu1 %v674_v49  ;;  %v272_v56 = vadd.f32 %v271_v53, %v194_v43  ;;  %v706_v49 = vld [vmem:[#allocation11 + $0x2e0] sm:$0xff] }
 0x14e   :  { %766 = vmatprep.subr.mxu1 %v671_v51  ;;  %v275_v58 = vpop.f32.mrf.mxu0  ;;  %v702_v51 = vld [vmem:[#allocation11 + $0x2c0] sm:$0xff] }
 0x14f   :  { %767 = vmatpush1.msra.mxu1 %v670_v52  ;;  %506 = vmatprep.mubr.f32.mxu1 %v272_v56  ;;  %v276_v63 = vadd.f32 %v275_v58, %v190_v44  ;;  %v699_v52 = vld [vmem:[#allocation11 + $0x2a8] sm:$0xff]  ;;  %v698_v53 = vld [vmem:[#allocation11 + $0x2a0] sm:$0xff] }
 0x150   :  { %768 = vmatprep.subr.mxu1 %v667_v54  ;;  %595 = vmatprep.mubr.f32.mxu0 %v272_v56  ;;  %v277_v61 = vpop.f32.mrf.mxu0  ;;  %v695_v54 = vld [vmem:[#allocation11 + $0x288] sm:$0xff] }
 0x151   :  { %769 = vmatpush1.msra.mxu1 %v666_v57  ;;  %v278_v1 = vadd.f32 %v277_v61, %v194_v43  ;;  %596 = vmatmul.mubr.f32.gmra.mxu0 %v270_v55  ;;  %v691_v56 = vld [vmem:[#allocation11 + $0x268] sm:$0xff]  ;;  %v690_v57 = vld [vmem:[#allocation11 + $0x260] sm:$0xff] }
 0x152   :  { %770 = vmatprep.subr.mxu1 %v663_v59  ;;  %507 = vmatmul.mubr.f32.gmra.mxu1 %v270_v55  ;;  %v281_v3 = vpop.f32.mrf.mxu0  ;;  %v694_v55 = vld [vmem:[#allocation11 + $0x280] sm:$0xff]  ;;  %v687_v58 = vld [vmem:[#allocation11 + $0x248] sm:$0xff] }
 0x153   :  { %771 = vmatpush1.msra.mxu1 %v662_v60  ;;  %512 = vmatprep.mubr.f32.mxu1 %v278_v1  ;;  %v282_v8 = vadd.f32 %v281_v3, %v190_v44  ;;  %v715_v44 = vld [vmem:[#allocation11 + $0x328] sm:$0xff]  ;;  %v686_v59 = vld [vmem:[#allocation11 + $0x240] sm:$0xff]  ;;  %v995_v3 = vld [vmem:[#allocation13 + $0xf0] sm:$0xff] }
 0x154   :  { %772 = vmatprep.subr.mxu1 %v659_v62  ;;  %601 = vmatprep.mubr.f32.mxu0 %v278_v1  ;;  %v283_v6 = vpop.f32.mrf.mxu0  ;;  %v683_v60 = vld [vmem:[#allocation11 + $0x228] sm:$0xff]  ;;  %v682_v61 = vld [vmem:[#allocation11 + $0x220] sm:$0xff] }
 0x155   :  { %773 = vmatpush1.msra.mxu1 %v658_v2  ;;  %v284_v9 = vadd.f32 %v283_v6, %v194_v43  ;;  %602 = vmatmul.mubr.f32.gmra.mxu0 %v276_v63  ;;  %v718_v43 = vld [vmem:[#allocation11 + $0x340] sm:$0xff]  ;;  %v679_v62 = vld [vmem:[#allocation11 + $0x208] sm:$0xff]  ;;  %v996_v2 = vld [vmem:[#allocation13 + $0xf8] sm:$0xff] }
 0x156   :  { %774 = vmatprep.subr.mxu1 %v655_v4  ;;  %513 = vmatmul.mubr.f32.gmra.mxu1 %v276_v63  ;;  %v678_v63 = vld [vmem:[#allocation11 + $0x200] sm:$0xff]  ;;  %v1636_v1 = vld [vmem:[#allocation2] sm:$0xff]  ;;  %v992_v6 = vld [vmem:[#allocation13 + $0xd8] sm:$0xff] }
 0x157   :  { %775 = vmatpush1.msra.mxu1 %v654_v5  ;;  %518 = vmatprep.mubr.f32.mxu1 %v284_v9  ;;  %v994_v4 = vld [vmem:[#allocation13 + $0xe8] sm:$0xff]  ;;  %v993_v5 = vld [vmem:[#allocation13 + $0xe0] sm:$0xff] }
 0x158   :  { %776 = vmatprep.subr.mxu1 %v651_v7  ;;  %607 = vmatprep.mubr.f32.mxu0 %v284_v9 }
 0x159   :  { %777 = vmatpush1.msra.mxu1 %v650_v10  ;;  %608 = vmatmul.mubr.f32.gmra.mxu0 %v282_v8 }
 0x15a   :  { %778 = vmatprep.subr.mxu1 %v647_v11  ;;  %519 = vmatmul.mubr.f32.gmra.mxu1 %v282_v8 }
 0x15b   :  { %779 = vmatpush1.msra.mxu1 %v646_v12  ;;  %828 = vmatprep.mubr.f32.mxu1 %v148_v13 }
 0x15c   :  { %780 = vmatprep.subr.mxu1 %v643_v14  ;;  %899 = vmatprep.mubr.f32.mxu0 %v148_v13  ;;  %v1642_v14 = vld [vmem:[%s1703_s7] sm:$0xf] }
 0x15d   :  { %781 = vmatpush1.msra.mxu1 %v642_v15  ;;  %v1647_v15 = vld [vmem:[%s1701_s5] sm:$0xf] }
 0x15e   :  { %782 = vmatprep.subr.mxu1 %v639_v16  ;;  %v747_v16 = vrot.slane %v1642_v14, %v1632_v41 }
 0x15f   :  { %783 = vmatpush1.msra.mxu1 %v638_v17 }
 0x160   :  { %784 = vmatprep.subr.mxu1 %v635_v18  ;;  %v751_v18 = vrot.slane %v1642_v14, %v1629_v40 }
 0x161   :  { %785 = vmatpush1.msra.mxu1 %v634_v19  ;;  %v419_v19 = vrot.slane %v1647_v15, %v1632_v41 }
 0x162   :  { %786 = vmatprep.subr.mxu1 %v631_v20 }
 0x163   :  { %787 = vmatpush1.msra.mxu1 %v630_v0  ;;  %v423_v0 = vrot.slane %v1647_v15, %v1629_v40 }
 0x164   :  { %788 = vmatprep.subr.mxu1 %v627_v21 }
 0x165   :  { %789 = vmatpush1.msra.mxu1 %v626_v22 }
 0x166   :  { %790 = vmatprep.subr.mxu1 %v623_v23 }
 0x167   :  { %791 = vmatpush1.msra.mxu1 %v622_v24 }
 0x168   :  { %792 = vmatprep.subr.mxu1 %v619_v25 }
 0x169   :  { %793 = vmatpush1.msra.mxu1 %v618_v26 }
 0x16a   :  { %794 = vmatprep.subr.mxu1 %v615_v27 }
 0x16b   :  { %795 = vmatpush1.msra.mxu1 %v614_v28 }
 0x16c   :  { %796 = vmatprep.subr.mxu1 %v739_v29 }
 0x16d   :  { %797 = vmatpush2.msra.mxu1 %v738_v30 }
 0x16e   :  { %798 = vmatprep.subr.mxu1 %v735_v31 }
 0x16f   :  { %799 = vmatpush2.msra.mxu1 %v734_v32 }
 0x170   :  { %800 = vmatprep.subr.mxu1 %v731_v33 }
 0x171   :  { %801 = vmatpush2.msra.mxu1 %v730_v34 }
 0x172   :  { %802 = vmatprep.subr.mxu1 %v727_v35 }
 0x173   :  { %803 = vmatpush2.msra.mxu1 %v726_v36 }
 0x174   :  { %804 = vmatprep.subr.mxu1 %v723_v37 }
 0x175   :  { %805 = vmatpush2.msra.mxu1 %v722_v38 }
 0x176   :  { %806 = vmatprep.subr.mxu1 %v719_v42 }
 0x177   :  { %807 = vmatpush2.msra.mxu1 %v718_v43 }
 0x178   :  { %808 = vmatprep.subr.mxu1 %v715_v44 }
 0x179   :  { %809 = vmatpush2.msra.mxu1 %v714_v45 }
 0x17a   :  { %810 = vmatprep.subr.mxu1 %v711_v46 }
 0x17b   :  { %811 = vmatpush2.msra.mxu1 %v710_v47 }
 0x17c   :  { %812 = vmatprep.subr.mxu1 %v707_v48 }
 0x17d   :  { %813 = vmatpush2.msra.mxu1 %v706_v49  ;;  %v991_v49 = vld [vmem:[#allocation13 + $0xd0] sm:$0xff] }
 0x17e   :  { %814 = vmatprep.subr.mxu1 %v703_v50  ;;  %v990_v50 = vld [vmem:[#allocation13 + $0xc8] sm:$0xff] }
 0x17f   :  { %815 = vmatpush2.msra.mxu1 %v702_v51  ;;  %v989_v51 = vld [vmem:[#allocation13 + $0xc0] sm:$0xff] }
 0x180   :  { %816 = vmatprep.subr.mxu1 %v699_v52  ;;  %v988_v52 = vld [vmem:[#allocation13 + $0xb8] sm:$0xff] }
 0x181   :  { %817 = vmatpush2.msra.mxu1 %v698_v53  ;;  %v987_v53 = vld [vmem:[#allocation13 + $0xb0] sm:$0xff] }
 0x182   :  { %818 = vmatprep.subr.mxu1 %v695_v54  ;;  %v986_v54 = vld [vmem:[#allocation13 + $0xa8] sm:$0xff] }
 0x183   :  { %819 = vmatpush2.msra.mxu1 %v694_v55  ;;  %v985_v55 = vld [vmem:[#allocation13 + $0xa0] sm:$0xff] }
 0x184   :  { %820 = vmatprep.subr.mxu1 %v691_v56  ;;  %v984_v56 = vld [vmem:[#allocation13 + $0x98] sm:$0xff] }
 0x185   :  { %821 = vmatpush2.msra.mxu1 %v690_v57  ;;  %v983_v57 = vld [vmem:[#allocation13 + $0x90] sm:$0xff] }
 0x186   :  { %822 = vmatprep.subr.mxu1 %v687_v58  ;;  %v982_v58 = vld [vmem:[#allocation13 + $0x88] sm:$0xff] }
 0x187   :  { %823 = vmatpush2.msra.mxu1 %v686_v59  ;;  %v981_v59 = vld [vmem:[#allocation13 + $0x80] sm:$0xff] }
 0x188   :  { %824 = vmatprep.subr.mxu1 %v683_v60  ;;  %v980_v60 = vld [vmem:[#allocation13 + $0x78] sm:$0xff] }
 0x189   :  { %825 = vmatpush2.msra.mxu1 %v682_v61  ;;  %v979_v61 = vld [vmem:[#allocation13 + $0x70] sm:$0xff] }
 0x18a   :  { %826 = vmatprep.subr.mxu1 %v679_v62  ;;  %v978_v62 = vld [vmem:[#allocation13 + $0x68] sm:$0xff] }
 0x18b   :  { %827 = vmatpush2.msra.mxu1 %v678_v63  ;;  %v977_v63 = vld [vmem:[#allocation13 + $0x60] sm:$0xff] }
 0x18c   :  { %829 = vmatmul.mubr.f32.vlgmr.msra.gmra.mxu1 %v1636_v1  ;;  %1041 = vmatprep.subr.mxu1 %v996_v2  ;;  %v976_v2 = vld [vmem:[#allocation13 + $0x58] sm:$0xff] }
 0x18d   :  { %1042 = vmatpush1.msra.mxu1 %v995_v3  ;;  %v975_v3 = vld [vmem:[#allocation13 + $0x50] sm:$0xff] }
 0x18e   :  { %1043 = vmatprep.subr.mxu1 %v994_v4  ;;  %v974_v4 = vld [vmem:[#allocation13 + $0x48] sm:$0xff] }
 0x18f   :  { %1044 = vmatpush1.msra.mxu1 %v993_v5  ;;  %v973_v5 = vld [vmem:[#allocation13 + $0x40] sm:$0xff] }
 0x190   :  { %1045 = vmatprep.subr.mxu1 %v992_v6  ;;  %v972_v6 = vld [vmem:[#allocation13 + $0x38] sm:$0xff] }
 0x191   :  { %1046 = vmatpush1.msra.mxu1 %v991_v49  ;;  %v997_v49 = vld [vmem:[#allocation13 + $0x100] sm:$0xff] }
 0x192   :  { %1047 = vmatprep.subr.mxu1 %v990_v50  ;;  %v677_v50 = vld [vmem:[#allocation11 + $0x1f8] sm:$0xff] }
 0x193   :  { %1048 = vmatpush1.msra.mxu1 %v989_v51  ;;  %v676_v51 = vld [vmem:[#allocation11 + $0x1f0] sm:$0xff]  ;;  %835 = vmatprep.subr.mxu0 %v677_v50  ;;  %v689_v50 = vld [vmem:[#allocation11 + $0x258] sm:$0xff] }
 0x194   :  { %1049 = vmatprep.subr.mxu1 %v988_v52  ;;  %v673_v52 = vld [vmem:[#allocation11 + $0x1d8] sm:$0xff]  ;;  %836 = vmatpush1.msra.mxu0 %v676_v51  ;;  %v688_v51 = vld [vmem:[#allocation11 + $0x250] sm:$0xff] }
 0x195   :  { %1050 = vmatpush1.msra.mxu1 %v987_v53  ;;  %v672_v53 = vld [vmem:[#allocation11 + $0x1d0] sm:$0xff]  ;;  %837 = vmatprep.subr.mxu0 %v673_v52  ;;  %v685_v52 = vld [vmem:[#allocation11 + $0x238] sm:$0xff] }
 0x196   :  { %1051 = vmatprep.subr.mxu1 %v986_v54  ;;  %v669_v54 = vld [vmem:[#allocation11 + $0x1b8] sm:$0xff]  ;;  %838 = vmatpush1.msra.mxu0 %v672_v53  ;;  %v684_v53 = vld [vmem:[#allocation11 + $0x230] sm:$0xff] }
 0x197   :  { %1052 = vmatpush1.msra.mxu1 %v985_v55  ;;  %v668_v55 = vld [vmem:[#allocation11 + $0x1b0] sm:$0xff]  ;;  %839 = vmatprep.subr.mxu0 %v669_v54  ;;  %v681_v54 = vld [vmem:[#allocation11 + $0x218] sm:$0xff] }
 0x198   :  { %1053 = vmatprep.subr.mxu1 %v984_v56  ;;  %v665_v56 = vld [vmem:[#allocation11 + $0x198] sm:$0xff]  ;;  %840 = vmatpush1.msra.mxu0 %v668_v55  ;;  %v680_v55 = vld [vmem:[#allocation11 + $0x210] sm:$0xff] }
 0x199   :  { %1054 = vmatpush1.msra.mxu1 %v983_v57  ;;  %v664_v57 = vld [vmem:[#allocation11 + $0x190] sm:$0xff]  ;;  %841 = vmatprep.subr.mxu0 %v665_v56  ;;  %v1143_v56 = vld [vmem:[#allocation14 + $0xf8] sm:$0xff] }
 0x19a   :  { %1055 = vmatprep.subr.mxu1 %v982_v58  ;;  %v661_v58 = vld [vmem:[#allocation11 + $0x178] sm:$0xff]  ;;  %842 = vmatpush1.msra.mxu0 %v664_v57  ;;  %v1142_v57 = vld [vmem:[#allocation14 + $0xf0] sm:$0xff] }
 0x19b   :  { %1056 = vmatpush1.msra.mxu1 %v981_v59  ;;  %v660_v59 = vld [vmem:[#allocation11 + $0x170] sm:$0xff]  ;;  %843 = vmatprep.subr.mxu0 %v661_v58  ;;  %v1141_v58 = vld [vmem:[#allocation14 + $0xe8] sm:$0xff] }
 0x19c   :  { %1057 = vmatprep.subr.mxu1 %v980_v60  ;;  %v657_v60 = vld [vmem:[#allocation11 + $0x158] sm:$0xff]  ;;  %844 = vmatpush1.msra.mxu0 %v660_v59  ;;  %v1140_v59 = vld [vmem:[#allocation14 + $0xe0] sm:$0xff] }
 0x19d   :  { %1058 = vmatpush1.msra.mxu1 %v979_v61  ;;  %v656_v61 = vld [vmem:[#allocation11 + $0x150] sm:$0xff]  ;;  %845 = vmatprep.subr.mxu0 %v657_v60  ;;  %v1139_v60 = vld [vmem:[#allocation14 + $0xd8] sm:$0xff] }
 0x19e   :  { %1059 = vmatprep.subr.mxu1 %v978_v62  ;;  %v653_v62 = vld [vmem:[#allocation11 + $0x138] sm:$0xff]  ;;  %846 = vmatpush1.msra.mxu0 %v656_v61 }
 0x19f   :  { %1060 = vmatpush1.msra.mxu1 %v977_v63  ;;  %v652_v63 = vld [vmem:[#allocation11 + $0x130] sm:$0xff]  ;;  %847 = vmatprep.subr.mxu0 %v653_v62 }
 0x1a0   :  { %1061 = vmatprep.subr.mxu1 %v976_v2  ;;  %v649_v2 = vld [vmem:[#allocation11 + $0x118] sm:$0xff]  ;;  %848 = vmatpush1.msra.mxu0 %v652_v63  ;;  %v1138_v62 = vld [vmem:[#allocation14 + $0xd0] sm:$0xff]  ;;  %v1137_v63 = vld [vmem:[#allocation14 + $0xc8] sm:$0xff] }
 0x1a1   :  { %1062 = vmatpush1.msra.mxu1 %v975_v3  ;;  %v648_v3 = vld [vmem:[#allocation11 + $0x110] sm:$0xff]  ;;  %849 = vmatprep.subr.mxu0 %v649_v2 }
 0x1a2   :  { %1063 = vmatprep.subr.mxu1 %v974_v4  ;;  %v645_v4 = vld [vmem:[#allocation11 + $0xf8] sm:$0xff]  ;;  %850 = vmatpush1.msra.mxu0 %v648_v3  ;;  %v1136_v3 = vld [vmem:[#allocation14 + $0xc0] sm:$0xff] }
 0x1a3   :  { %1064 = vmatpush1.msra.mxu1 %v973_v5  ;;  %v644_v5 = vld [vmem:[#allocation11 + $0xf0] sm:$0xff]  ;;  %851 = vmatprep.subr.mxu0 %v645_v4  ;;  %v1135_v4 = vld [vmem:[#allocation14 + $0xb8] sm:$0xff] }
 0x1a4   :  { %1065 = vmatprep.subr.mxu1 %v972_v6  ;;  %v641_v6 = vld [vmem:[#allocation11 + $0xd8] sm:$0xff]  ;;  %852 = vmatpush1.msra.mxu0 %v644_v5 }
 0x1a5   :  { %853 = vmatprep.subr.mxu0 %v641_v6  ;;  %v1134_v6 = vld [vmem:[#allocation14 + $0xb0] sm:$0xff] }
 0x20c   :  { %v502_v7 = vpop.f32.mrf.mxu1 }
 0x20d   :  { %v503_v25 = vadd.f32 %v502_v7, %v419_v19  ;;  %v971_v7 = vld [vmem:[#allocation13 + $0x30] sm:$0xff] }
 0x20e   :  { %v504_v8 = vpop.f32.mrf.mxu1  ;;  %1066 = vmatpush1.msra.mxu1 %v971_v7  ;;  %v640_v7 = vld [vmem:[#allocation11 + $0xd0] sm:$0xff] }
 0x20f   :  { %v505_v26 = vadd.f32 %v504_v8, %v423_v0  ;;  %v970_v8 = vld [vmem:[#allocation13 + $0x28] sm:$0xff]  ;;  %854 = vmatpush1.msra.mxu0 %v640_v7 }
 0x210   :  { %1067 = vmatprep.subr.mxu1 %v970_v8  ;;  %v637_v8 = vld [vmem:[#allocation11 + $0xb8] sm:$0xff] }
 0x211   :  { %855 = vmatprep.subr.mxu0 %v637_v8  ;;  %v1132_v8 = vld [vmem:[#allocation14 + $0xa0] sm:$0xff] }
 0x212   :  { %v508_v9 = vpop.f32.mrf.mxu1 }
 0x213   :  { %v509_v36 = vadd.f32 %v508_v9, %v419_v19  ;;  %v969_v9 = vld [vmem:[#allocation13 + $0x20] sm:$0xff] }
 0x214   :  { %v510_v10 = vpop.f32.mrf.mxu1  ;;  %1068 = vmatpush1.msra.mxu1 %v969_v9  ;;  %v636_v9 = vld [vmem:[#allocation11 + $0xb0] sm:$0xff] }
 0x215   :  { %v511_v30 = vadd.f32 %v510_v10, %v423_v0  ;;  %v968_v10 = vld [vmem:[#allocation13 + $0x18] sm:$0xff]  ;;  %856 = vmatpush1.msra.mxu0 %v636_v9 }
 0x216   :  { %v514_v11 = vpop.f32.mrf.mxu1  ;;  %1069 = vmatprep.subr.mxu1 %v968_v10  ;;  %v633_v10 = vld [vmem:[#allocation11 + $0x98] sm:$0xff] }
 0x217   :  { %v515_v27 = vadd.f32 %v514_v11, %v419_v19  ;;  %v967_v11 = vld [vmem:[#allocation13 + $0x10] sm:$0xff]  ;;  %857 = vmatprep.subr.mxu0 %v633_v10  ;;  %v1131_v10 = vld [vmem:[#allocation14 + $0x98] sm:$0xff] }
 0x218   :  { %v516_v12 = vpop.f32.mrf.mxu1  ;;  %1070 = vmatpush1.msra.mxu1 %v967_v11  ;;  %v632_v11 = vld [vmem:[#allocation11 + $0x90] sm:$0xff] }
 0x219   :  { %v517_v28 = vadd.f32 %v516_v12, %v423_v0  ;;  %v966_v12 = vld [vmem:[#allocation13 + $0x8] sm:$0xff]  ;;  %858 = vmatpush1.msra.mxu0 %v632_v11 }
 0x21a   :  { %v520_v13 = vpop.f32.mrf.mxu1  ;;  %1071 = vmatprep.subr.mxu1 %v966_v12  ;;  %v629_v12 = vld [vmem:[#allocation11 + $0x78] sm:$0xff] }
 0x21b   :  { %v521_v37 = vadd.f32 %v520_v13, %v419_v19  ;;  %v965_v13 = vld [vmem:[#allocation13] sm:$0xff]  ;;  %859 = vmatprep.subr.mxu0 %v629_v12  ;;  %v1130_v12 = vld [vmem:[#allocation14 + $0x90] sm:$0xff] }
 0x21c   :  { %v522_v17 = vpop.f32.mrf.mxu1  ;;  %1072 = vmatpush1.msra.mxu1 %v965_v13  ;;  %v1025_v19 = vld [vmem:[#allocation13 + $0x1e0] sm:$0xff]  ;;  %v628_v13 = vld [vmem:[#allocation11 + $0x70] sm:$0xff] }
 0x21d   :  { %v523_v31 = vadd.f32 %v522_v17, %v423_v0  ;;  %v1027_v17 = vld [vmem:[#allocation13 + $0x1f0] sm:$0xff]  ;;  %860 = vmatpush1.msra.mxu0 %v628_v13 }
 0x21e   :  { %v1023_v0 = vld [vmem:[#allocation13 + $0x1d0] sm:$0xff] }
 0x24c   :  { %v830_v20 = vpop.f32.mrf.mxu1 }
 0x24d   :  { %v831_v21 = vadd.f32 %v830_v20, %v747_v16  ;;  %v1028_v16 = vld [vmem:[#allocation13 + $0x1f8] sm:$0xff] }
 0x24e   :  { %v832_v22 = vpop.f32.mrf.mxu1  ;;  %1073 = vmatprep.subr.mxu1 %v1028_v16  ;;  %v1024_v20 = vld [vmem:[#allocation13 + $0x1d8] sm:$0xff] }
 0x24f   :  { %v906_v23 = vmul.f32 0.0625, %v831_v21  ;;  %v833_v24 = vadd.f32 %v832_v22, %v751_v18  ;;  %1074 = vmatpush2.msra.mxu1 %v1027_v17  ;;  %v1026_v18 = vld [vmem:[#allocation13 + $0x1e8] sm:$0xff]  ;;  %v1021_v22 = vld [vmem:[#allocation13 + $0x1c0] sm:$0xff]  ;;  %v625_v16 = vld [vmem:[#allocation11 + $0x58] sm:$0xff] }
 0x250   :  { %1075 = vmatprep.subr.mxu1 %v1026_v18  ;;  %v1022_v21 = vld [vmem:[#allocation13 + $0x1c8] sm:$0xff]  ;;  %v624_v17 = vld [vmem:[#allocation11 + $0x50] sm:$0xff]  ;;  %v621_v18 = vld [vmem:[#allocation11 + $0x38] sm:$0xff]  ;;  %861 = vmatprep.subr.mxu0 %v625_v16 }
 0x251   :  { %v907_v29 = vmul.f32 0.0625, %v833_v24  ;;  %v918_v32 = vmul.f32 %v906_v23, %v515_v27  ;;  %v908_v34 = vmul.f32 %v906_v23, %v503_v25  ;;  %v923_v45 = vmul.f32 %v906_v23, %v521_v37  ;;  %1076 = vmatpush2.msra.mxu1 %v1025_v19  ;;  %v1019_v24 = vld [vmem:[#allocation13 + $0x1b0] sm:$0xff]  ;;  %v1018_v25 = vld [vmem:[#allocation13 + $0x1a8] sm:$0xff]  ;;  %v1016_v27 = vld [vmem:[#allocation13 + $0x198] sm:$0xff]  ;;  %862 = vmatpush1.msra.mxu0 %v624_v17 }
 0x252   :  { %v913_v46 = vmul.f32 %v906_v23, %v509_v36  ;;  %1077 = vmatprep.subr.mxu1 %v1024_v20  ;;  %v1020_v23 = vld [vmem:[#allocation13 + $0x1b8] sm:$0xff]  ;;  %v1007_v36 = vld [vmem:[#allocation13 + $0x150] sm:$0xff]  ;;  %v1006_v37 = vld [vmem:[#allocation13 + $0x148] sm:$0xff]  ;;  %863 = vmatprep.subr.mxu0 %v621_v18 }
 0x253   :  { %v919_v33 = vmul.f32 %v907_v29, %v517_v28  ;;  %v909_v35 = vmul.f32 %v907_v29, %v505_v26  ;;  %v924_v43 = vmul.f32 %v907_v29, %v523_v31  ;;  %v914_v44 = vmul.f32 %v907_v29, %v511_v30  ;;  %1078 = vmatpush2.msra.mxu1 %v1023_v0  ;;  %v1017_v26 = vld [vmem:[#allocation13 + $0x1a0] sm:$0xff]  ;;  %v1015_v28 = vld [vmem:[#allocation13 + $0x190] sm:$0xff]  ;;  %v1014_v29 = vld [vmem:[#allocation13 + $0x188] sm:$0xff] }
 0x254   :  { %1079 = vmatprep.subr.mxu1 %v1022_v21  ;;  %v1013_v30 = vld [vmem:[#allocation13 + $0x180] sm:$0xff]  ;;  %v1012_v31 = vld [vmem:[#allocation13 + $0x178] sm:$0xff]  ;;  %v620_v19 = vld [vmem:[#allocation11 + $0x30] sm:$0xff] }
 0x255   :  { %v920_v38 = vadd.f32 %v919_v33, %v918_v32  ;;  %v910_v42 = vadd.f32 %v909_v35, %v908_v34  ;;  %v925_v47 = vadd.f32 %v924_v43, %v923_v45  ;;  %v915_v48 = vadd.f32 %v914_v44, %v913_v46  ;;  %1080 = vmatpush2.msra.mxu1 %v1021_v22  ;;  %v1011_v32 = vld [vmem:[#allocation13 + $0x170] sm:$0xff]  ;;  %v1010_v33 = vld [vmem:[#allocation13 + $0x168] sm:$0xff]  ;;  %v1009_v34 = vld [vmem:[#allocation13 + $0x160] sm:$0xff] }
 0x256   :  { %1081 = vmatprep.subr.mxu1 %v1020_v23  ;;  %v1008_v35 = vld [vmem:[#allocation13 + $0x158] sm:$0xff]  ;;  %v1003_v43 = vld [vmem:[#allocation13 + $0x130] sm:$0xff]  ;;  %v1002_v44 = vld [vmem:[#allocation13 + $0x128] sm:$0xff]  ;;  %864 = vmatpush1.msra.mxu0 %v620_v19 }
 0x257   :  { %921 = vadd.xlane.f32.xlu1 %v920_v38  ;;  %911 = vadd.xlane.f32.xlu0 %v910_v42  ;;  %v1005_v38 = vld [vmem:[#allocation13 + $0x140] sm:$0xff]  ;;  %v1004_v42 = vld [vmem:[#allocation13 + $0x138] sm:$0xff]  ;;  %v616_v0 = vld [vmem:[#allocation11 + $0x10] sm:$0xff] }
 0x258   :  { %1082 = vmatpush2.msra.mxu1 %v1019_v24  ;;  %v1001_v45 = vld [vmem:[#allocation13 + $0x120] sm:$0xff]  ;;  %v1000_v46 = vld [vmem:[#allocation13 + $0x118] sm:$0xff]  ;;  %v740_v22 = vld [vmem:[#allocation11 + $0x3f0] sm:$0xff] }
 0x259   :  { %1083 = vmatprep.subr.mxu1 %v1018_v25  ;;  %v617_v20 = vld [vmem:[#allocation11 + $0x18] sm:$0xff]  ;;  %v736_v24 = vld [vmem:[#allocation11 + $0x3d0] sm:$0xff]  ;;  %v1129_v16 = vld [vmem:[#allocation14 + $0x88] sm:$0xff] }
 0x25a   :  { %1084 = vmatpush2.msra.mxu1 %v1017_v26  ;;  %v741_v21 = vld [vmem:[#allocation11 + $0x3f8] sm:$0xff]  ;;  %865 = vmatprep.subr.mxu0 %v617_v20  ;;  %v732_v26 = vld [vmem:[#allocation11 + $0x3b0] sm:$0xff]  ;;  %v1128_v17 = vld [vmem:[#allocation14 + $0x80] sm:$0xff] }
 0x25b   :  { %926 = vadd.xlane.f32.xlu1 %v925_v47  ;;  %916 = vadd.xlane.f32.xlu0 %v915_v48  ;;  %v999_v47 = vld [vmem:[#allocation13 + $0x110] sm:$0xff]  ;;  %v998_v48 = vld [vmem:[#allocation13 + $0x108] sm:$0xff]  ;;  %v737_v23 = vld [vmem:[#allocation11 + $0x3d8] sm:$0xff] }
 0x25c   :  { %1085 = vmatprep.subr.mxu1 %v1016_v27  ;;  %866 = vmatpush1.msra.mxu0 %v616_v0  ;;  %v733_v25 = vld [vmem:[#allocation11 + $0x3b8] sm:$0xff] }
 0x25d   :  { %1086 = vmatpush2.msra.mxu1 %v1015_v28  ;;  %867 = vmatprep.subr.mxu0 %v741_v21  ;;  %v729_v27 = vld [vmem:[#allocation11 + $0x398] sm:$0xff]  ;;  %v728_v28 = vld [vmem:[#allocation11 + $0x390] sm:$0xff] }
 0x25e   :  { %1087 = vmatprep.subr.mxu1 %v1014_v29  ;;  %868 = vmatpush2.msra.mxu0 %v740_v22  ;;  %v725_v29 = vld [vmem:[#allocation11 + $0x378] sm:$0xff]  ;;  %v1126_v22 = vld [vmem:[#allocation14 + $0x70] sm:$0xff] }
 0x25f   :  { %1088 = vmatpush2.msra.mxu1 %v1013_v30  ;;  %869 = vmatprep.subr.mxu0 %v737_v23  ;;  %v724_v30 = vld [vmem:[#allocation11 + $0x370] sm:$0xff]  ;;  %v1127_v0 = vld [vmem:[#allocation14 + $0x78] sm:$0xff] }
 0x260   :  { %1089 = vmatprep.subr.mxu1 %v1012_v31  ;;  %870 = vmatpush2.msra.mxu0 %v736_v24  ;;  %v721_v31 = vld [vmem:[#allocation11 + $0x358] sm:$0xff] }
 0x261   :  { %1090 = vmatpush2.msra.mxu1 %v1011_v32  ;;  %871 = vmatprep.subr.mxu0 %v733_v25  ;;  %v720_v32 = vld [vmem:[#allocation11 + $0x350] sm:$0xff]  ;;  %v1125_v25 = vld [vmem:[#allocation14 + $0x68] sm:$0xff] }
 0x262   :  { %1091 = vmatprep.subr.mxu1 %v1010_v33  ;;  %872 = vmatpush2.msra.mxu0 %v732_v26  ;;  %v717_v33 = vld [vmem:[#allocation11 + $0x338] sm:$0xff] }
 0x263   :  { %1092 = vmatpush2.msra.mxu1 %v1009_v34  ;;  %873 = vmatprep.subr.mxu0 %v729_v27  ;;  %v716_v34 = vld [vmem:[#allocation11 + $0x330] sm:$0xff]  ;;  %v1124_v27 = vld [vmem:[#allocation14 + $0x60] sm:$0xff] }
 0x264   :  { %1093 = vmatprep.subr.mxu1 %v1008_v35  ;;  %874 = vmatpush2.msra.mxu0 %v728_v28  ;;  %v713_v35 = vld [vmem:[#allocation11 + $0x318] sm:$0xff] }
 0x265   :  { %1094 = vmatpush2.msra.mxu1 %v1007_v36  ;;  %875 = vmatprep.subr.mxu0 %v725_v29  ;;  %v712_v36 = vld [vmem:[#allocation11 + $0x310] sm:$0xff]  ;;  %v1123_v28 = vld [vmem:[#allocation14 + $0x58] sm:$0xff] }
 0x266   :  { %1095 = vmatprep.subr.mxu1 %v1006_v37  ;;  %876 = vmatpush2.msra.mxu0 %v724_v30  ;;  %v709_v37 = vld [vmem:[#allocation11 + $0x2f8] sm:$0xff]  ;;  %v1122_v30 = vld [vmem:[#allocation14 + $0x50] sm:$0xff] }
 0x267   :  { %1096 = vmatpush2.msra.mxu1 %v1005_v38  ;;  %877 = vmatprep.subr.mxu0 %v721_v31  ;;  %v708_v38 = vld [vmem:[#allocation11 + $0x2f0] sm:$0xff]  ;;  %v1121_v31 = vld [vmem:[#allocation14 + $0x48] sm:$0xff] }
 0x268   :  { %1097 = vmatprep.subr.mxu1 %v1004_v42  ;;  %878 = vmatpush2.msra.mxu0 %v720_v32  ;;  %v705_v42 = vld [vmem:[#allocation11 + $0x2d8] sm:$0xff]  ;;  %v1120_v32 = vld [vmem:[#allocation14 + $0x40] sm:$0xff] }
 0x269   :  { %1098 = vmatpush2.msra.mxu1 %v1003_v43  ;;  %879 = vmatprep.subr.mxu0 %v717_v33  ;;  %v704_v43 = vld [vmem:[#allocation11 + $0x2d0] sm:$0xff]  ;;  %v1119_v33 = vld [vmem:[#allocation14 + $0x38] sm:$0xff] }
 0x26a   :  { %1099 = vmatprep.subr.mxu1 %v1002_v44  ;;  %880 = vmatpush2.msra.mxu0 %v716_v34  ;;  %v701_v44 = vld [vmem:[#allocation11 + $0x2b8] sm:$0xff]  ;;  %v1118_v34 = vld [vmem:[#allocation14 + $0x30] sm:$0xff] }
 0x26b   :  { %1100 = vmatpush2.msra.mxu1 %v1001_v45  ;;  %881 = vmatprep.subr.mxu0 %v713_v35  ;;  %v700_v45 = vld [vmem:[#allocation11 + $0x2b0] sm:$0xff]  ;;  %v1117_v35 = vld [vmem:[#allocation14 + $0x28] sm:$0xff] }
 0x26c   :  { %1101 = vmatprep.subr.mxu1 %v1000_v46  ;;  %882 = vmatpush2.msra.mxu0 %v712_v36  ;;  %v697_v46 = vld [vmem:[#allocation11 + $0x298] sm:$0xff]  ;;  %v1116_v36 = vld [vmem:[#allocation14 + $0x20] sm:$0xff] }
 0x26d   :  { %1102 = vmatpush2.msra.mxu1 %v999_v47  ;;  %883 = vmatprep.subr.mxu0 %v709_v37  ;;  %v696_v47 = vld [vmem:[#allocation11 + $0x290] sm:$0xff]  ;;  %v1115_v37 = vld [vmem:[#allocation14 + $0x18] sm:$0xff] }
 0x26e   :  { %1103 = vmatprep.subr.mxu1 %v998_v48  ;;  %884 = vmatpush2.msra.mxu0 %v708_v38  ;;  %v693_v48 = vld [vmem:[#allocation11 + $0x278] sm:$0xff]  ;;  %v1114_v38 = vld [vmem:[#allocation14 + $0x10] sm:$0xff] }
 0x26f   :  { %1104 = vmatpush2.msra.mxu1 %v997_v49  ;;  %885 = vmatprep.subr.mxu0 %v705_v42  ;;  %v692_v49 = vld [vmem:[#allocation11 + $0x270] sm:$0xff]  ;;  %v1658_v42 = vpop.f32.mrf.mxu0 }
 0x270   :  { %886 = vmatpush2.msra.mxu0 %v704_v43  ;;  %v1113_v43 = vld [vmem:[#allocation14 + $0x8] sm:$0xff] }
 0x271   :  { %887 = vmatprep.subr.mxu0 %v701_v44  ;;  %v1112_v44 = vld [vmem:[#allocation14] sm:$0xff] }
 0x272   :  { %888 = vmatpush2.msra.mxu0 %v700_v45  ;;  %v1175_v45 = vld [vmem:[#allocation14 + $0x1f8] sm:$0xff] }
 0x273   :  { %889 = vmatprep.subr.mxu0 %v697_v46 }
 0x274   :  { %890 = vmatpush2.msra.mxu0 %v696_v47  ;;  %v1174_v47 = vld [vmem:[#allocation14 + $0x1f0] sm:$0xff] }
 0x275   :  { %891 = vmatprep.subr.mxu0 %v693_v48 }
 0x276   :  { %892 = vmatpush2.msra.mxu0 %v692_v49  ;;  %v593_v49 = vpop.f32.mrf.mxu0 }
 0x277   :  { %893 = vmatprep.subr.mxu0 %v689_v50  ;;  %v1173_v50 = vld [vmem:[#allocation14 + $0x1e8] sm:$0xff] }
 0x278   :  { %894 = vmatpush2.msra.mxu0 %v688_v51 }
 0x279   :  { %895 = vmatprep.subr.mxu0 %v685_v52  ;;  %v1172_v52 = vld [vmem:[#allocation14 + $0x1e0] sm:$0xff] }
 0x27a   :  { %896 = vmatpush2.msra.mxu0 %v684_v53 }
 0x27b   :  { %897 = vmatprep.subr.mxu0 %v681_v54  ;;  %v597_v54 = vpop.f32.mrf.mxu0 }
 0x27c   :  { %898 = vmatpush2.msra.mxu0 %v680_v55  ;;  %v1171_v55 = vld [vmem:[#allocation14 + $0x1d8] sm:$0xff] }
 0x27d   :  { %900 = vmatmul.mubr.f32.vlgmr.msra.gmra.mxu0 %v1636_v1  ;;  %1176 = vmatprep.subr.mxu0 %v1143_v56  ;;  %v1133_v1 = vld [vmem:[#allocation14 + $0xa8] sm:$0xff] }
 0x27e   :  { %1177 = vmatpush1.msra.mxu0 %v1142_v57  ;;  %v1170_v57 = vld [vmem:[#allocation14 + $0x1d0] sm:$0xff] }
 0x27f   :  { %1178 = vmatprep.subr.mxu0 %v1141_v58 }
 0x280   :  { %1179 = vmatpush1.msra.mxu0 %v1140_v59  ;;  %v1169_v59 = vld [vmem:[#allocation14 + $0x1c8] sm:$0xff] }
 0x281   :  { %1180 = vmatprep.subr.mxu0 %v1139_v60 }
 0x282   :  { %1181 = vmatpush1.msra.mxu0 %v1138_v62  ;;  %v599_v62 = vpop.f32.mrf.mxu0 }
 0x283   :  { %1182 = vmatprep.subr.mxu0 %v1137_v63  ;;  %v1167_v63 = vld [vmem:[#allocation14 + $0x1b8] sm:$0xff] }
 0x284   :  { %1183 = vmatpush1.msra.mxu0 %v1136_v3  ;;  %v1165_v3 = vld [vmem:[#allocation14 + $0x1a8] sm:$0xff] }
 0x285   :  { %1184 = vmatprep.subr.mxu0 %v1135_v4  ;;  %v1164_v4 = vld [vmem:[#allocation14 + $0x1a0] sm:$0xff] }
 0x286   :  { %1185 = vmatpush1.msra.mxu0 %v1134_v6  ;;  %v1163_v6 = vld [vmem:[#allocation14 + $0x198] sm:$0xff] }
 0x287   :  { %1186 = vmatprep.subr.mxu0 %v1133_v1  ;;  %v430_v1 = vsub.s32 3, %v1626_v39 }
 0x288   :  { %1187 = vmatpush1.msra.mxu0 %v1132_v8  ;;  %v1161_v8 = vld [vmem:[#allocation14 + $0x188] sm:$0xff] }
 0x289   :  { %1188 = vmatprep.subr.mxu0 %v1131_v10  ;;  %v426_v10 = vsub.s32 2, %v1626_v39 }
 0x28a   :  { %1189 = vmatpush1.msra.mxu0 %v1130_v12  ;;  %v1159_v12 = vld [vmem:[#allocation14 + $0x178] sm:$0xff] }
 0x28b   :  { %1190 = vmatprep.subr.mxu0 %v1129_v16  ;;  %v431_v16 = vrot.slane %v1647_v15, %v430_v1 }
 0x28c   :  { %1191 = vmatpush1.msra.mxu0 %v1128_v17  ;;  %v1157_v17 = vld [vmem:[#allocation14 + $0x168] sm:$0xff] }
 0x28d   :  { %1192 = vmatprep.subr.mxu0 %v1127_v0  ;;  %v1155_v0 = vld [vmem:[#allocation14 + $0x158] sm:$0xff] }
 0x28e   :  { %1193 = vmatpush1.msra.mxu0 %v1126_v22 }
 0x28f   :  { %1194 = vmatprep.subr.mxu0 %v1125_v25  ;;  %v600_v25 = vadd.f32 %v599_v62, %v431_v16  ;;  %v1029_v62 = vld [vmem:[%s1705_s9] sm:$0x3]  ;;  %s1517_s9 = smov [#allocation16]  }
 0x290   :  { %1195 = vmatpush1.msra.mxu0 %v1124_v27  ;;  %s1271_s27 = sshll.u32 %s1517_s9, 4  ;;  %s1272_s27 = int_to_ptr.vmem [resolvable:$true] %s1271_s27 }
 0x291   :  { %1196 = vmatprep.subr.mxu0 %v1123_v28  ;;  %p1475_p13 = scmp.lt.s32.totalorder %s1272_s27, %s1272_s27 }
 0x292   :  { %1197 = vmatpush1.msra.mxu0 %v1122_v30 }
 0x293   :  { %1198 = vmatprep.subr.mxu0 %v1121_v31 }
 0x294   :  { %1199 = vmatpush1.msra.mxu0 %v1120_v32  ;;  %v1151_v32 = vld [vmem:[#allocation14 + $0x138] sm:$0xff] }
 0x295   :  { %1200 = vmatprep.subr.mxu0 %v1119_v33 }
 0x296   :  { %1201 = vmatpush1.msra.mxu0 %v1118_v34 }
 0x297   :  { %1202 = vmatprep.subr.mxu0 %v1117_v35 }
 0x298   :  { %1203 = vmatpush1.msra.mxu0 %v1116_v36 }
 0x299   :  { %1204 = vmatprep.subr.mxu0 %v1115_v37  ;;  %v1150_v37 = vld [vmem:[#allocation14 + $0x130] sm:$0xff] }
 0x29a   :  { %1205 = vmatpush1.msra.mxu0 %v1114_v38 }
 0x29b   :  { %1206 = vmatprep.subr.mxu0 %v1113_v43 }
 0x29c   :  { %1207 = vmatpush1.msra.mxu0 %v1112_v44 }
 0x29d   :  { %1208 = vmatprep.subr.mxu0 %v1175_v45 }
 0x29e   :  { %1209 = vmatpush2.msra.mxu0 %v1174_v47 }
 0x29f   :  { %1210 = vmatprep.subr.mxu0 %v1173_v50 }
 0x2a0   :  { %1211 = vmatpush2.msra.mxu0 %v1172_v52 }
 0x2a1   :  { %1212 = vmatprep.subr.mxu0 %v1171_v55 }
 0x2a2   :  { %1213 = vmatpush2.msra.mxu0 %v1170_v57  ;;  %v1148_v57 = vld [vmem:[#allocation14 + $0x120] sm:$0xff] }
 0x2a3   :  { %1214 = vmatprep.subr.mxu0 %v1169_v59  ;;  %v1146_v59 = vld [vmem:[#allocation14 + $0x110] sm:$0xff] }
 0x2e0   :  { %v912_v61 = vpop.xlane.xlu0 %911  ;;  %v922_v2 = vpop.xlane.xlu1 %921 }
 0x2e4   :  { %v917_v5 = vpop.xlane.xlu0 %916  ;;  %v927_v11 = vpop.xlane.xlu1 %926 }
 0x2e5   :  { %v928_v7 = vmax.f32 %v912_v61, %v917_v5 }
 0x2e7   :  { %v929_v9 = vmax.f32 %v928_v7, %v922_v2  ;;  %v1162_v7 = vld [vmem:[#allocation14 + $0x190] sm:$0xff] }
 0x2e9   :  { %v930_v13 = vmax.f32 %v929_v9, %v927_v11  ;;  %v1160_v9 = vld [vmem:[#allocation14 + $0x180] sm:$0xff] }
 0x2eb   :  { %v931_v18 = vsub.f32 %v912_v61, %v930_v13  ;;  %v934_v19 = vsub.f32 %v917_v5, %v930_v13  ;;  %v937_v20 = vsub.f32 %v922_v2, %v930_v13  ;;  %v940_v21 = vsub.f32 %v927_v11, %v930_v13  ;;  %v1168_v61 = vld [vmem:[#allocation14 + $0x1c0] sm:$0xff]  ;;  %v1166_v2 = vld [vmem:[#allocation14 + $0x1b0] sm:$0xff]  ;;  %v603_v5 = vpop.f32.mrf.mxu0 }
 0x2ec   :  { %1215 = vmatpush2.msra.mxu0 %v1168_v61  ;;  %v1158_v13 = vld [vmem:[#allocation14 + $0x170] sm:$0xff]  ;;  %v1144_v61 = vld [vmem:[#allocation14 + $0x100] sm:$0xff] }
 0x2ed   :  { %v932_v23 = vmul.f32 1.442695, %v931_v18  ;;  %v935_v24 = vmul.f32 1.442695, %v934_v19  ;;  %v938_v26 = vmul.f32 1.442695, %v937_v20  ;;  %1216 = vmatprep.subr.mxu0 %v1167_v63  ;;  %v605_v11 = vpop.f32.mrf.mxu0  ;;  %v427_v19 = vrot.slane %v1647_v15, %v426_v10 }
 0x2ee   :  { %v941_v29 = vmul.f32 1.442695, %v940_v21  ;;  %1217 = vmatpush2.msra.mxu0 %v1166_v2  ;;  %v1156_v18 = vld [vmem:[#allocation14 + $0x160] sm:$0xff]  ;;  %v1154_v21 = vld [vmem:[#allocation14 + $0x150] sm:$0xff]  ;;  %v606_v33 = vadd.f32 %v605_v11, %v431_v16  ;;  %v1038_v63 = vrot.slane %v1029_v62, %v1629_v40  ;;  %v1034_v2 = vrot.slane %v1029_v62, %v1632_v41 }
 0x2ef   :  { %1300 = vpow2.f32 %v932_v23  ;;  %1218 = vmatprep.subr.mxu0 %v1165_v3  ;;  %v609_v20 = vpop.f32.mrf.mxu0  ;;  %v594_v23 = vadd.f32 %v593_v49, %v431_v16  ;;  %v592_v30 = vadd.f32 %v1658_v42, %v427_v19  ;;  %v598_v15 = vadd.f32 %v597_v54, %v427_v19 }
 0x2f0   :  { %1302 = vpow2.f32 %v935_v24  ;;  %1219 = vmatpush2.msra.mxu0 %v1164_v4  ;;  %v1153_v24 = vld [vmem:[#allocation14 + $0x148] sm:$0xff]  ;;  %v604_v38 = vadd.f32 %v603_v5, %v427_v19  ;;  %v759_v11 = vrot.slane %v1642_v14, %v430_v1 }
 0x2f1   :  { %1304 = vpow2.f32 %v938_v26  ;;  %1220 = vmatprep.subr.mxu0 %v1163_v6  ;;  %v611_v31 = vpop.f32.mrf.mxu0 }
 0x2f2   :  { %1306 = vpow2.f32 %v941_v29  ;;  %1221 = vmatpush2.msra.mxu0 %v1162_v7  ;;  %v1152_v29 = vld [vmem:[#allocation14 + $0x140] sm:$0xff]  ;;  %v612_v45 = vadd.f32 %v611_v31, %v431_v16 }
 0x2f3   :  { %1222 = vmatprep.subr.mxu0 %v1161_v8  ;;  %v755_v8 = vrot.slane %v1642_v14, %v426_v10 }
 0x2f4   :  { %1223 = vmatpush2.msra.mxu0 %v1160_v9  ;;  %v1249_v9 = vld [vmem:[%s1707_s11] sm:$0x3]  ;;  %s1470_s11 = scalar_lea.vmem %s1272_s27, 256 }
 0x2f5   :  { %1224 = vmatprep.subr.mxu0 %v1159_v12  ;;  %v1254_v16 = vrot.slane %v1249_v9, %v1632_v41  ;;  %p1471_p12 = scmp.ne.s32.totalorder %s1272_s27, %s1470_s11  ;;  %p1476_p0 = scmp.lt.s32.totalorder %s1470_s11, %s1470_s11 }
 0x2f6   :  { %1225 = vmatpush2.msra.mxu0 %v1158_v13 }
 0x2f7   :  { %1226 = vmatprep.subr.mxu0 %v1157_v17  ;;  %p1477_p1 = por %p1476_p0, %p1475_p13 }
 0x2f8   :  { %1227 = vmatpush2.msra.mxu0 %v1156_v18 }
 0x2f9   :  { %1228 = vmatprep.subr.mxu0 %v1155_v0  ;;  %p1478_p2 = pnand %p1477_p1, %p1471_p12 }
 0x2fa   :  { %1229 = vmatpush2.msra.mxu0 %v1154_v21 }
 0x2fb   :  { %1230 = vmatprep.subr.mxu0 %v1153_v24 }
 0x2fc   :  { %v1660_v46 = vpop.eup %1300  ;;  %1231 = vmatpush2.msra.mxu0 %v1152_v29 }
 0x2fd   :  { %v1662_v48 = vpop.eup %1302  ;;  %1232 = vmatprep.subr.mxu0 %v1151_v32 }
 0x2fe   :  { %v943_v51 = vadd.f32 %v1662_v48, %v1660_v46  ;;  %v1305_v53 = vpop.eup %1304  ;;  %1233 = vmatpush2.msra.mxu0 %v1150_v37 }
 0x2ff   :  { %v1307_v58 = vpop.eup %1306 }
 0x300   :  { %v944_v56 = vadd.f32 %v1305_v53, %v943_v51 }
 0x302   :  { %v945_v60 = vadd.f32 %v1307_v58, %v944_v56  ;;  %v1149_v56 = vld [vmem:[#allocation14 + $0x128] sm:$0xff] }
 0x303   :  { %1234 = vmatprep.subr.mxu0 %v1149_v56 }
 0x304   :  { %1308 = vrcp.f32 %v945_v60  ;;  %1235 = vmatpush2.msra.mxu0 %v1148_v57  ;;  %v1145_v60 = vld [vmem:[#allocation14 + $0x108] sm:$0xff] }
 0x311   :  { %v1309_v22 = vpop.eup %1308 }
 0x312   :  { %v947_v26 = vmul.f32 %v1309_v22, %v1660_v46  ;;  %v950_v27 = vmul.f32 %v1309_v22, %v1662_v48  ;;  %v955_v28 = vmul.f32 %v1309_v22, %v1305_v53  ;;  %v960_v36 = vmul.f32 %v1309_v22, %v1307_v58  ;;  %v1147_v58 = vld [vmem:[#allocation14 + $0x118] sm:$0xff] }
 0x313   :  { %v610_v48 = vadd.f32 %v609_v20, %v427_v19  ;;  %1236 = vmatprep.subr.mxu0 %v1147_v58  ;;  %v1258_v20 = vrot.slane %v1249_v9, %v1629_v40 }
 0x314   :  { %v949_v34 = vmul.f32 %v947_v26, %v594_v23  ;;  %v952_v35 = vmul.f32 %v950_v27, %v600_v25  ;;  %v948_v43 = vmul.f32 %v947_v26, %v592_v30  ;;  %v951_v44 = vmul.f32 %v950_v27, %v598_v15  ;;  %1237 = vmatpush2.msra.mxu0 %v1146_v59 }
 0x315   :  { %v957_v47 = vmul.f32 %v955_v28, %v606_v33  ;;  %v956_v49 = vmul.f32 %v955_v28, %v604_v38  ;;  %v962_v51 = vmul.f32 %v960_v36, %v612_v45  ;;  %v961_v53 = vmul.f32 %v960_v36, %v610_v48  ;;  %1238 = vmatprep.subr.mxu0 %v1145_v60 }
 0x316   :  { %v954_v46 = vadd.f32 %v952_v35, %v949_v34  ;;  %v953_v42 = vadd.f32 %v951_v44, %v948_v43  ;;  %1239 = vmatpush2.msra.mxu0 %v1144_v61 }
 0x318   :  { %v959_v50 = vadd.f32 %v957_v47, %v954_v46  ;;  %v958_v52 = vadd.f32 %v956_v49, %v953_v42 }
 0x31a   :  { %v964_v54 = vadd.f32 %v962_v51, %v959_v50  ;;  %v963_v55 = vadd.f32 %v961_v53, %v958_v52 }
 0x31c   :  { %1105 = vmatprep.mubr.f32.mxu1 %v964_v54 }
 0x31d   :  { %1106 = vmatmul.mubr.f32.vlgmr.msra.gmra.mxu1 %v963_v55 }
 0x33d   :  { %v901_v7 = vpop.f32.mrf.mxu0 }
 0x33e   :  { %v902_v13 = vadd.f32 %v901_v7, %v755_v8 }
 0x33f   :  { %v903_v12 = vpop.f32.mrf.mxu0 }
 0x340   :  { %v904_v18 = vadd.f32 %v903_v12, %v759_v11 }
 0x3dd   :  { %v1107_v3 = vpop.f32.mrf.mxu1 }
 0x3de   :  { %v1108_v6 = vadd.f32 %v1107_v3, %v1034_v2 }
 0x3df   :  { %v1109_v4 = vpop.f32.mrf.mxu1 }
 0x3e0   :  { %v1110_v5 = vadd.f32 %v1109_v4, %v1038_v63 }
 0x3e2   :  { %1240 = vmatprep.mubr.f32.mxu0 %v1110_v5 }
 0x3e3   :  { %1241 = vmatmul.mubr.f32.vlgmr.msra.gmra.mxu0 %v1108_v6 }
 0x4a3   :  { %v1242_v17 = vpop.f32.mrf.mxu0 }
 0x4a4   :  { %v1247_v19 = vadd.f32 %v1242_v17, %v902_v13 }
 0x4a5   :  { %v1244_v0 = vpop.f32.mrf.mxu0 }
 0x4a6   :  { %v1261_v10 = vadd.f32 %v1254_v16, %v1247_v19  ;;  %v1248_v21 = vadd.f32 %v1244_v0, %v904_v18 }
 0x4a8   :  { %1263 = vst [vmem:[#allocation16] sm:$0xff] %v1261_v10  ;;  %v1262_v22 = vadd.f32 %v1258_v20, %v1248_v21 }
 0x4aa   :  { %1264 = vst [vmem:[#allocation16 + $0x8] sm:$0xff] %v1262_v22 }
 0x4ab   :  { %1481 = shalt.err (!%p1478_p2)
}
 0x4ac   :  { %1274 = dma.vmem_to_hbm [thread:$0]  %s1272_s27, 256, %s1708_s12, [#allocation4]  }
 0x4ad   :  { %1500 = dma.done.wait [#allocation4], 256  }
 0x4ae   :  { %1501 = vsyncadd [#allocation4], 4294967040 }
 0x4af   :  { %1278 = vsyncpa [#allocation3], 1 }
 0x4b0   :  { %1279 = vsyncpa [#allocation6], 1 }
 0x4b1   :  { %1280 = vsyncpa [#allocation9], 1 }
 0x4b2   :  { %1281 = vsyncpa [#allocation12], 1 }
 0x4b3   :  { %1282 = vsyncpa [#allocation15], 1 }
 0x4b4   :  { %1283 = vsyncpa [#allocation4], 1 }

</bundles_post_ra>
